<compile_context>
chip_gen: v5e
topology: v5e:2x2
jax: 0.10.0
libtpu: 0.0.40
codegen_flags: <defaults>
</compile_context>

<pallas_src>
import math
import functools

import jax
import jax.numpy as jnp
from jax.experimental import pallas as pl
from jax.experimental.pallas import tpu as pltpu


def _nt_dot(a, b):
    """(M, Kd) x (N, Kd) -> (M, N): A @ B^T on the MXU with bf16 inputs, f32 accumulate."""
    return jax.lax.dot_general(
        a.astype(jnp.bfloat16), b.astype(jnp.bfloat16),
        (((1,), (1,)), ((), ())),
        preferred_element_type=jnp.float32)


def _decoder_layer_kernel(x_ref, padf_ref, cos_ref, sin_ref,
                          ln1w_ref, ln1b_ref,
                          wq_ref, bq_ref, wk_ref, bk_ref, wv_ref, bv_ref,
                          wo_ref, bo_ref,
                          ln2w_ref, ln2b_ref,
                          w1_ref, b1_ref, w2_ref, b2_ref,
                          o_ref,
                          *, num_heads, use_rope, ffn_chunk):
    x = x_ref[0].astype(jnp.float32)                      # (T, D) f32
    T, D = x.shape
    hd = D // num_heads
    half = hd // 2
    eps = jnp.float32(1e-5)

    def layer_norm(z, w, b):
        mu = jnp.mean(z, axis=-1, keepdims=True)
        var = jnp.mean((z - mu) ** 2, axis=-1, keepdims=True)
        return (z - mu) * jax.lax.rsqrt(var + eps) * w + b

    # ---------- pre-norm 1 + QKV projections (bf16 MXU, f32 accumulate) ----------
    xn = layer_norm(x, ln1w_ref[...], ln1b_ref[...]).astype(jnp.bfloat16)
    q = jnp.dot(xn, wq_ref[...], preferred_element_type=jnp.float32) + bq_ref[...]
    k = jnp.dot(xn, wk_ref[...], preferred_element_type=jnp.float32) + bk_ref[...]
    v = jnp.dot(xn, wv_ref[...], preferred_element_type=jnp.float32) + bv_ref[...]

    # ---------- additive mask: causal + key padding (finite bias, reused by all heads) ----
    row = jax.lax.broadcasted_iota(jnp.int32, (T, T), 0)
    col = jax.lax.broadcasted_iota(jnp.int32, (T, T), 1)
    pad = padf_ref[0]                                     # (1, T): 1.0 real, 0.0 pad
    mask_bias = jnp.where((col > row) | (pad < 0.5),
                          jnp.float32(-1e30), jnp.float32(0.0))

    scale = jnp.float32(1.0 / math.sqrt(hd))
    cosf = cos_ref[...]                                   # (T, half) f32
    sinf = sin_ref[...]

    # ---------- attention; per-head outputs folded straight into W_o ----------
    attn_acc = jnp.zeros((T, D), jnp.float32)
    for h in range(num_heads):                            # static unroll over heads
        lo, hi = h * hd, (h + 1) * hd
        qh = q[:, lo:hi]
        kh = k[:, lo:hi]
        vh = v[:, lo:hi]
        if use_rope:
            q1, q2 = qh[:, :half], qh[:, half:]
            k1, k2 = kh[:, :half], kh[:, half:]
            qa = q1 * cosf - q2 * sinf
            qb = q2 * cosf + q1 * sinf
            ka = k1 * cosf - k2 * sinf
            kb = k2 * cosf + k1 * sinf
            # q_rot @ k_rot^T == qa @ ka^T + qb @ kb^T  (no concatenate / relayout)
            scores = _nt_dot(qa, ka) + _nt_dot(qb, kb)
        else:
            scores = _nt_dot(qh, kh)
        scores = scores * scale + mask_bias
        m = jnp.max(scores, axis=-1, keepdims=True)
        p = jnp.exp(scores - m)
        l = jnp.sum(p, axis=-1, keepdims=True)
        attn = p * pl.reciprocal(l, approx=True)          # softmax over keys
        ctx = jnp.dot(attn.astype(jnp.bfloat16), vh.astype(jnp.bfloat16),
                      preferred_element_type=jnp.float32)  # (T, hd)
        # concat(heads) @ W_o  ==  sum_h  ctx_h @ W_o[h]   (W_o pre-reshaped (H, hd, D))
        attn_acc = attn_acc + jnp.dot(ctx.astype(jnp.bfloat16), wo_ref[h],
                                      preferred_element_type=jnp.float32)

    x1 = x + attn_acc + bo_ref[...]                       # residual 1 (f32)

    # ---------- pre-norm 2 + chunked FFN ----------
    xn2 = layer_norm(x1, ln2w_ref[...], ln2b_ref[...]).astype(jnp.bfloat16)
    dff = w1_ref.shape[1]
    inv_sqrt2 = jnp.float32(1.0 / math.sqrt(2.0))
    n_chunks = (dff + ffn_chunk - 1) // ffn_chunk
    ffn_acc = jnp.zeros((T, D), jnp.float32)
    for c in range(n_chunks):                             # static unroll over d_ff chunks
        c0 = c * ffn_chunk
        c1 = min(dff, c0 + ffn_chunk)
        h1 = jnp.dot(xn2, w1_ref[:, c0:c1],
                     preferred_element_type=jnp.float32) + b1_ref[:, c0:c1]
        # exact (erf-based) GELU in f32, matching torch.nn.GELU() default
        h1 = 0.5 * h1 * (1.0 + jax.lax.erf(h1 * inv_sqrt2))
        ffn_acc = ffn_acc + jnp.dot(h1.astype(jnp.bfloat16), w2_ref[c0:c1, :],
                                    preferred_element_type=jnp.float32)

    o_ref[0] = (x1 + ffn_acc + b2_ref[...]).astype(o_ref.dtype)   # residual 2


def decoder_layer_forward(x, pad_mask, params, *, num_heads, use_rope, ffn_chunk=512):
    """x: (B, T, D) float32; pad_mask: (B, T) bool (True = real token)."""
    B, T, D = x.shape
    hd = D // num_heads
    half = hd // 2
    dff = params["w1"].shape[1]
    chunk = min(ffn_chunk, dff)

    padf = pad_mask.astype(jnp.float32).reshape(B, 1, T)

    # RoPE tables (same recipe as RotaryPositionalEncoding; unused when use_rope=False)
    inv_freq = 1.0 / (10000.0 ** (jnp.arange(half, dtype=jnp.float32) / half))
    theta = jnp.arange(T, dtype=jnp.float32)[:, None] * inv_freq[None, :]
    cos = jnp.cos(theta)                                  # (T, half)
    sin = jnp.sin(theta)

    bf16 = jnp.bfloat16
    # Matmul weights live in HBM/VMEM as bf16 (halves DMA/VMEM, MXU-native);
    # LayerNorm params and biases stay f32. W_o pre-reshaped to (H, hd, D) so the
    # kernel indexes heads on the leading axis (no sublane slicing of a packed ref).
    kargs = [
        params["ln1_w"], params["ln1_b"],
        params["wq"].astype(bf16), params["bq"],
        params["wk"].astype(bf16), params["bk"],
        params["wv"].astype(bf16), params["bv"],
        params["wo"].astype(bf16).reshape(num_heads, hd, D), params["bo"],
        params["ln2_w"], params["ln2_b"],
        params["w1"].astype(bf16), params["b1"],
        params["w2"].astype(bf16), params["b2"],
    ]

    def full_spec(arr):
        nd = arr.ndim
        return pl.BlockSpec(arr.shape, lambda b, _nd=nd: (0,) * _nd)

    in_specs = [
        pl.BlockSpec((1, T, D), lambda b: (b, 0, 0)),     # x
        pl.BlockSpec((1, 1, T), lambda b: (b, 0, 0)),     # pad mask (float)
        full_spec(cos), full_spec(sin),
    ] + [full_spec(p) for p in kargs]

    # VMEM budget: resident (double-buffered) params + per-step activation working set.
    def nbytes(a):
        return int(a.size) * a.dtype.itemsize
    resident = 2 * sum(nbytes(a) for a in kargs) + 2 * (nbytes(cos) + nbytes(sin))
    io_bufs = 2 * 2 * (T * D * 4) + 2 * (T * 4)           # x + out blocks, pad row
    work = 4 * (8 * T * D + 3 * T * T + 2 * T * chunk)    # rough f32 activation bound
    vmem_limit = int(min(64 << 20,                         # v7x physical ceiling
                         max(32 << 20, (resident + io_bufs + work) * 2 + (4 << 20))))

    kernel = functools.partial(_decoder_layer_kernel, num_heads=num_heads,
                               use_rope=use_rope, ffn_chunk=chunk)

    return pl.pallas_call(
        kernel,
        out_shape=jax.ShapeDtypeStruct((B, T, D), x.dtype),
        grid=(B,),
        in_specs=in_specs,
        out_specs=pl.BlockSpec((1, T, D), lambda b: (b, 0, 0)),
        compiler_params=pltpu.CompilerParams(
            dimension_semantics=("parallel",),
            vmem_limit_bytes=vmem_limit),
    )(x, padf, cos, sin, *kargs)


def reference_forward(x, pad_mask, params, *, num_heads, use_rope):
    """Pure-JAX f32 reference mirroring the PyTorch forward (eval mode)."""
    B, T, D = x.shape
    hd = D // num_heads
    half = hd // 2
    eps = 1e-5

    def ln(z, w, b):
        mu = jnp.mean(z, axis=-1, keepdims=True)
        var = jnp.mean((z - mu) ** 2, axis=-1, keepdims=True)
        return (z - mu) / jnp.sqrt(var + eps) * w + b

    xn = ln(x, params["ln1_w"], params["ln1_b"])
    q = xn @ params["wq"] + params["bq"]
    k = xn @ params["wk"] + params["bk"]
    v = xn @ params["wv"] + params["bv"]
    q = q.reshape(B, T, num_heads, hd).transpose(0, 2, 1, 3)
    k = k.reshape(B, T, num_heads, hd).transpose(0, 2, 1, 3)
    v = v.reshape(B, T, num_heads, hd).transpose(0, 2, 1, 3)

    if use_rope:
        inv_freq = 1.0 / (10000.0 ** (jnp.arange(half, dtype=jnp.float32) / half))
        theta = jnp.arange(T, dtype=jnp.float32)[:, None] * inv_freq[None, :]
        cos = jnp.cos(theta)[None, None]
        sin = jnp.sin(theta)[None, None]
        q1, q2 = q[..., :half], q[..., half:]
        k1, k2 = k[..., :half], k[..., half:]
        q = jnp.concatenate([q1 * cos - q2 * sin, q2 * cos + q1 * sin], axis=-1)
        k = jnp.concatenate([k1 * cos - k2 * sin, k2 * cos + k1 * sin], axis=-1)

    causal = jnp.triu(jnp.ones((T, T), dtype=bool), k=1)[None, None]
    keypad = ~pad_mask[:, None, None, :]
    mask = jnp.where(causal | keypad, -jnp.inf, 0.0).astype(jnp.float32)

    scores = jnp.einsum("bhqd,bhkd->bhqk", q, k) / math.sqrt(hd) + mask
    attn = jax.nn.softmax(scores, axis=-1)
    out = jnp.einsum("bhqk,bhkd->bhqd", attn, v)
    out = out.transpose(0, 2, 1, 3).reshape(B, T, D)
    attn_out = out @ params["wo"] + params["bo"]

    x1 = x + attn_out
    xn2 = ln(x1, params["ln2_w"], params["ln2_b"])
    h = xn2 @ params["w1"] + params["b1"]
    h = 0.5 * h * (1.0 + jax.lax.erf(h / math.sqrt(2.0)))
    ffn = h @ params["w2"] + params["b2"]
    return x1 + ffn


def init_params(key, d_model, dim_feedforward):
    ks = jax.random.split(key, 12)
    n = lambda k, shape: (0.05 * jax.random.normal(k, shape)).astype(jnp.float32)
    return {
        "ln1_w": jnp.ones((1, d_model), jnp.float32),
        "ln1_b": jnp.zeros((1, d_model), jnp.float32),
        "wq": n(ks[0], (d_model, d_model)), "bq": n(ks[1], (1, d_model)),
        "wk": n(ks[2], (d_model, d_model)), "bk": n(ks[3], (1, d_model)),
        "wv": n(ks[4], (d_model, d_model)), "bv": n(ks[5], (1, d_model)),
        "wo": n(ks[6], (d_model, d_model)), "bo": n(ks[7], (1, d_model)),
        "ln2_w": jnp.ones((1, d_model), jnp.float32),
        "ln2_b": jnp.zeros((1, d_model), jnp.float32),
        "w1": n(ks[8], (d_model, dim_feedforward)), "b1": n(ks[9], (1, dim_feedforward)),
        "w2": n(ks[10], (dim_feedforward, d_model)), "b2": n(ks[11], (1, d_model)),
    }


if __name__ == "__main__":
    B, T, d_model, nhead, dim_feedforward = 2, 8, 32, 4, 64

    key = jax.random.PRNGKey(0)
    kx, kp = jax.random.split(key)
    x = jax.random.normal(kx, (B, T, d_model), dtype=jnp.float32)
    params = init_params(kp, d_model, dim_feedforward)

    # pad mask: True = real token; second sequence has 2 trailing pads
    lengths = jnp.array([T, T - 2])
    pad_mask = jnp.arange(T)[None, :] < lengths[:, None]

    # module default is use_rope=False; also exercise the RoPE path
    for use_rope in (False, True):
        out = decoder_layer_forward(x, pad_mask, params,
                                    num_heads=nhead, use_rope=use_rope)
        out = jax.block_until_ready(out)
        ref = reference_forward(x, pad_mask, params,
                                num_heads=nhead, use_rope=use_rope)
        assert out.shape == (B, T, d_model)
        err = float(jnp.max(jnp.abs(out - ref)))
        # bf16 MXU operands vs f32 reference => loosened tolerance
        assert err < 5e-2, f"use_rope={use_rope}: max abs err {err}"

    print("KERNEL_OK")
</pallas_src>

<mosaic_0001>
module attributes {stable_mosaic.version = 11 : i64} {
  func.func @_decoder_layer_kernel(%arg0: i32, %arg1: memref<1x8x32xf32, #tpu.memory_space<vmem>>, %arg2: memref<1x1x8xf32, #tpu.memory_space<vmem>>, %arg3: memref<8x4xf32, #tpu.memory_space<vmem>>, %arg4: memref<8x4xf32, #tpu.memory_space<vmem>>, %arg5: memref<1x32xf32, #tpu.memory_space<vmem>>, %arg6: memref<1x32xf32, #tpu.memory_space<vmem>>, %arg7: memref<32x32xbf16, #tpu.memory_space<vmem>>, %arg8: memref<1x32xf32, #tpu.memory_space<vmem>>, %arg9: memref<32x32xbf16, #tpu.memory_space<vmem>>, %arg10: memref<1x32xf32, #tpu.memory_space<vmem>>, %arg11: memref<32x32xbf16, #tpu.memory_space<vmem>>, %arg12: memref<1x32xf32, #tpu.memory_space<vmem>>, %arg13: memref<4x8x32xbf16, #tpu.memory_space<vmem>>, %arg14: memref<1x32xf32, #tpu.memory_space<vmem>>, %arg15: memref<1x32xf32, #tpu.memory_space<vmem>>, %arg16: memref<1x32xf32, #tpu.memory_space<vmem>>, %arg17: memref<32x64xbf16, #tpu.memory_space<vmem>>, %arg18: memref<1x64xf32, #tpu.memory_space<vmem>>, %arg19: memref<64x32xbf16, #tpu.memory_space<vmem>>, %arg20: memref<1x32xf32, #tpu.memory_space<vmem>>, %arg21: memref<1x8x32xf32, #tpu.memory_space<vmem>>) attributes {dimension_semantics = [#tpu.dimension_semantics<parallel>], iteration_bounds = array<i64: 2>, scalar_prefetch = 0 : i64, scratch_operands = 0 : i64, tpu.core_type = #tpu.core_type<tc>, window_params = [{transform_indices = @transform_0, window_bounds = array<i64: 1, 8, 32>}, {transform_indices = @transform_1, window_bounds = array<i64: 1, 1, 8>}, {pipeline_mode = #tpu.pipeline_mode<synchronous>, transform_indices = @transform_2, window_bounds = array<i64: 8, 4>}, {pipeline_mode = #tpu.pipeline_mode<synchronous>, transform_indices = @transform_3, window_bounds = array<i64: 8, 4>}, {pipeline_mode = #tpu.pipeline_mode<synchronous>, transform_indices = @transform_4, window_bounds = array<i64: 1, 32>}, {pipeline_mode = #tpu.pipeline_mode<synchronous>, transform_indices = @transform_5, window_bounds = array<i64: 1, 32>}, {pipeline_mode = #tpu.pipeline_mode<synchronous>, transform_indices = @transform_6, window_bounds = array<i64: 32, 32>}, {pipeline_mode = #tpu.pipeline_mode<synchronous>, transform_indices = @transform_7, window_bounds = array<i64: 1, 32>}, {pipeline_mode = #tpu.pipeline_mode<synchronous>, transform_indices = @transform_8, window_bounds = array<i64: 32, 32>}, {pipeline_mode = #tpu.pipeline_mode<synchronous>, transform_indices = @transform_9, window_bounds = array<i64: 1, 32>}, {pipeline_mode = #tpu.pipeline_mode<synchronous>, transform_indices = @transform_10, window_bounds = array<i64: 32, 32>}, {pipeline_mode = #tpu.pipeline_mode<synchronous>, transform_indices = @transform_11, window_bounds = array<i64: 1, 32>}, {pipeline_mode = #tpu.pipeline_mode<synchronous>, transform_indices = @transform_12, window_bounds = array<i64: 4, 8, 32>}, {pipeline_mode = #tpu.pipeline_mode<synchronous>, transform_indices = @transform_13, window_bounds = array<i64: 1, 32>}, {pipeline_mode = #tpu.pipeline_mode<synchronous>, transform_indices = @transform_14, window_bounds = array<i64: 1, 32>}, {pipeline_mode = #tpu.pipeline_mode<synchronous>, transform_indices = @transform_15, window_bounds = array<i64: 1, 32>}, {pipeline_mode = #tpu.pipeline_mode<synchronous>, transform_indices = @transform_16, window_bounds = array<i64: 32, 64>}, {pipeline_mode = #tpu.pipeline_mode<synchronous>, transform_indices = @transform_17, window_bounds = array<i64: 1, 64>}, {pipeline_mode = #tpu.pipeline_mode<synchronous>, transform_indices = @transform_18, window_bounds = array<i64: 64, 32>}, {pipeline_mode = #tpu.pipeline_mode<synchronous>, transform_indices = @transform_19, window_bounds = array<i64: 1, 32>}, {transform_indices = @transform_20, window_bounds = array<i64: 1, 8, 32>}]} {
    %c0 = arith.constant 0 : index
    %c0_0 = arith.constant 0 : index
    %c0_1 = arith.constant 0 : index
    %0 = vector.load %arg1[%c0, %c0_0, %c0_1] : memref<1x8x32xf32, #tpu.memory_space<vmem>>, vector<1x8x32xf32>
    %1 = vector.shape_cast %0 : vector<1x8x32xf32> to vector<8x32xf32>
    %c0_2 = arith.constant 0 : index
    %c0_3 = arith.constant 0 : index
    %2 = vector.load %arg5[%c0_2, %c0_3] : memref<1x32xf32, #tpu.memory_space<vmem>>, vector<1x32xf32>
    %c0_4 = arith.constant 0 : index
    %c0_5 = arith.constant 0 : index
    %3 = vector.load %arg6[%c0_4, %c0_5] : memref<1x32xf32, #tpu.memory_space<vmem>>, vector<1x32xf32>
    %cst = arith.constant dense<0.000000e+00> : vector<8xf32>
    %4 = vector.multi_reduction <add>, %1, %cst [1] : vector<8x32xf32> to vector<8xf32>
    %5 = vector.shape_cast %4 : vector<8xf32> to vector<8x1xf32>
    %cst_6 = arith.constant 3.200000e+01 : f32
    %6 = vector.broadcast %cst_6 : f32 to vector<8x1xf32>
    %7 = arith.divf %5, %6 : vector<8x1xf32>
    %8 = vector.broadcast %7 : vector<8x1xf32> to vector<8x32xf32>
    %9 = arith.subf %1, %8 : vector<8x32xf32>
    %10 = arith.mulf %9, %9 : vector<8x32xf32>
    %cst_7 = arith.constant dense<0.000000e+00> : vector<8xf32>
    %11 = vector.multi_reduction <add>, %10, %cst_7 [1] : vector<8x32xf32> to vector<8xf32>
    %12 = vector.shape_cast %11 : vector<8xf32> to vector<8x1xf32>
    %cst_8 = arith.constant 3.200000e+01 : f32
    %13 = vector.broadcast %cst_8 : f32 to vector<8x1xf32>
    %14 = arith.divf %12, %13 : vector<8x1xf32>
    %15 = vector.broadcast %7 : vector<8x1xf32> to vector<8x32xf32>
    %16 = arith.subf %1, %15 : vector<8x32xf32>
    %cst_9 = arith.constant 9.99999974E-6 : f32
    %17 = vector.broadcast %cst_9 : f32 to vector<8x1xf32>
    %18 = arith.addf %14, %17 : vector<8x1xf32>
    %19 = math.rsqrt %18 : vector<8x1xf32>
    %20 = vector.broadcast %19 : vector<8x1xf32> to vector<8x32xf32>
    %21 = arith.mulf %16, %20 : vector<8x32xf32>
    %22 = vector.broadcast %2 : vector<1x32xf32> to vector<8x32xf32>
    %23 = arith.mulf %21, %22 : vector<8x32xf32>
    %24 = vector.broadcast %3 : vector<1x32xf32> to vector<8x32xf32>
    %25 = arith.addf %23, %24 : vector<8x32xf32>
    %26 = arith.truncf %25 : vector<8x32xf32> to vector<8x32xbf16>
    %c0_10 = arith.constant 0 : index
    %c0_11 = arith.constant 0 : index
    %27 = vector.load %arg7[%c0_10, %c0_11] : memref<32x32xbf16, #tpu.memory_space<vmem>>, vector<32x32xbf16>
    %cst_12 = arith.constant dense<0.000000e+00> : vector<8x32xf32>
    %28 = tpu.matmul %26, %27, %cst_12 {dimension_numbers = #tpu.dot_dimension_numbers<[1], [0], [0], [1], [0, 0, 1, 1], [], []>} : vector<8x32xbf16>, vector<32x32xbf16>, vector<8x32xf32> -> vector<8x32xf32>
    %c0_13 = arith.constant 0 : index
    %c0_14 = arith.constant 0 : index
    %29 = vector.load %arg8[%c0_13, %c0_14] : memref<1x32xf32, #tpu.memory_space<vmem>>, vector<1x32xf32>
    %30 = vector.broadcast %29 : vector<1x32xf32> to vector<8x32xf32>
    %31 = arith.addf %28, %30 : vector<8x32xf32>
    %c0_15 = arith.constant 0 : index
    %c0_16 = arith.constant 0 : index
    %32 = vector.load %arg9[%c0_15, %c0_16] : memref<32x32xbf16, #tpu.memory_space<vmem>>, vector<32x32xbf16>
    %cst_17 = arith.constant dense<0.000000e+00> : vector<8x32xf32>
    %33 = tpu.matmul %26, %32, %cst_17 {dimension_numbers = #tpu.dot_dimension_numbers<[1], [0], [0], [1], [0, 0, 1, 1], [], []>} : vector<8x32xbf16>, vector<32x32xbf16>, vector<8x32xf32> -> vector<8x32xf32>
    %c0_18 = arith.constant 0 : index
    %c0_19 = arith.constant 0 : index
    %34 = vector.load %arg10[%c0_18, %c0_19] : memref<1x32xf32, #tpu.memory_space<vmem>>, vector<1x32xf32>
    %35 = vector.broadcast %34 : vector<1x32xf32> to vector<8x32xf32>
    %36 = arith.addf %33, %35 : vector<8x32xf32>
    %c0_20 = arith.constant 0 : index
    %c0_21 = arith.constant 0 : index
    %37 = vector.load %arg11[%c0_20, %c0_21] : memref<32x32xbf16, #tpu.memory_space<vmem>>, vector<32x32xbf16>
    %cst_22 = arith.constant dense<0.000000e+00> : vector<8x32xf32>
    %38 = tpu.matmul %26, %37, %cst_22 {dimension_numbers = #tpu.dot_dimension_numbers<[1], [0], [0], [1], [0, 0, 1, 1], [], []>} : vector<8x32xbf16>, vector<32x32xbf16>, vector<8x32xf32> -> vector<8x32xf32>
    %c0_23 = arith.constant 0 : index
    %c0_24 = arith.constant 0 : index
    %39 = vector.load %arg12[%c0_23, %c0_24] : memref<1x32xf32, #tpu.memory_space<vmem>>, vector<1x32xf32>
    %40 = vector.broadcast %39 : vector<1x32xf32> to vector<8x32xf32>
    %41 = arith.addf %38, %40 : vector<8x32xf32>
    %42 = tpu.iota {dimensions = array<i32: 0>} : vector<8x8xi32>
    %43 = tpu.iota {dimensions = array<i32: 1>} : vector<8x8xi32>
    %c0_25 = arith.constant 0 : index
    %c0_26 = arith.constant 0 : index
    %c0_27 = arith.constant 0 : index
    %44 = vector.load %arg2[%c0_25, %c0_26, %c0_27] : memref<1x1x8xf32, #tpu.memory_space<vmem>>, vector<1x1x8xf32>
    %45 = vector.shape_cast %44 : vector<1x1x8xf32> to vector<1x8xf32>
    %46 = arith.cmpi sgt, %43, %42 : vector<8x8xi32>
    %cst_28 = arith.constant 5.000000e-01 : f32
    %47 = vector.broadcast %cst_28 : f32 to vector<1x8xf32>
    %48 = arith.cmpf olt, %45, %47 : vector<1x8xf32>
    %49 = vector.broadcast %48 : vector<1x8xi1> to vector<8x8xi1>
    %50 = arith.ori %46, %49 : vector<8x8xi1>
    %cst_29 = arith.constant -1.000000e+30 : f32
    %cst_30 = arith.constant 0.000000e+00 : f32
    %51 = vector.broadcast %cst_29 : f32 to vector<8x8xf32>
    %52 = vector.broadcast %cst_30 : f32 to vector<8x8xf32>
    %53 = arith.select %50, %51, %52 : vector<8x8xi1>, vector<8x8xf32>
    %cst_31 = arith.constant 0.000000e+00 : f32
    %54 = vector.broadcast %cst_31 : f32 to vector<8x32xf32>
    %55 = vector.extract_strided_slice %31 {offsets = [0, 0], sizes = [8, 8], strides = [1, 1]} : vector<8x32xf32> to vector<8x8xf32>
    %56 = vector.extract_strided_slice %36 {offsets = [0, 0], sizes = [8, 8], strides = [1, 1]} : vector<8x32xf32> to vector<8x8xf32>
    %57 = vector.extract_strided_slice %41 {offsets = [0, 0], sizes = [8, 8], strides = [1, 1]} : vector<8x32xf32> to vector<8x8xf32>
    %58 = arith.truncf %55 : vector<8x8xf32> to vector<8x8xbf16>
    %59 = arith.truncf %56 : vector<8x8xf32> to vector<8x8xbf16>
    %cst_32 = arith.constant dense<0.000000e+00> : vector<8x8xf32>
    %60 = tpu.matmul %58, %59, %cst_32 {dimension_numbers = #tpu.dot_dimension_numbers<[1], [1], [0], [0], [0, 0, 1, 0], [], []>} : vector<8x8xbf16>, vector<8x8xbf16>, vector<8x8xf32> -> vector<8x8xf32>
    %cst_33 = arith.constant 0.353553385 : f32
    %61 = vector.broadcast %cst_33 : f32 to vector<8x8xf32>
    %62 = arith.mulf %60, %61 : vector<8x8xf32>
    %63 = arith.addf %62, %53 : vector<8x8xf32>
    %cst_34 = arith.constant dense<0xFF800000> : vector<8xf32>
    %64 = vector.multi_reduction <maximumf>, %63, %cst_34 [1] : vector<8x8xf32> to vector<8xf32>
    %65 = vector.shape_cast %64 : vector<8xf32> to vector<8x1xf32>
    %66 = vector.broadcast %65 : vector<8x1xf32> to vector<8x8xf32>
    %67 = arith.subf %63, %66 : vector<8x8xf32>
    %68 = math.exp %67 : vector<8x8xf32>
    %cst_35 = arith.constant dense<0.000000e+00> : vector<8xf32>
    %69 = vector.multi_reduction <add>, %68, %cst_35 [1] : vector<8x8xf32> to vector<8xf32>
    %70 = vector.shape_cast %69 : vector<8xf32> to vector<8x1xf32>
    %71 = tpu.reciprocal %70 {approx = true} : vector<8x1xf32> -> vector<8x1xf32>
    %72 = vector.broadcast %71 : vector<8x1xf32> to vector<8x8xf32>
    %73 = arith.mulf %68, %72 : vector<8x8xf32>
    %74 = arith.truncf %73 : vector<8x8xf32> to vector<8x8xbf16>
    %75 = arith.truncf %57 : vector<8x8xf32> to vector<8x8xbf16>
    %cst_36 = arith.constant dense<0.000000e+00> : vector<8x8xf32>
    %76 = tpu.matmul %74, %75, %cst_36 {dimension_numbers = #tpu.dot_dimension_numbers<[1], [0], [0], [1], [0, 0, 1, 1], [], []>} : vector<8x8xbf16>, vector<8x8xbf16>, vector<8x8xf32> -> vector<8x8xf32>
    %77 = arith.truncf %76 : vector<8x8xf32> to vector<8x8xbf16>
    %c0_37 = arith.constant 0 : index
    %c0_38 = arith.constant 0 : index
    %c0_39 = arith.constant 0 : index
    %78 = vector.load %arg13[%c0_37, %c0_38, %c0_39] : memref<4x8x32xbf16, #tpu.memory_space<vmem>>, vector<1x8x32xbf16>
    %79 = vector.shape_cast %78 : vector<1x8x32xbf16> to vector<8x32xbf16>
    %cst_40 = arith.constant dense<0.000000e+00> : vector<8x32xf32>
    %80 = tpu.matmul %77, %79, %cst_40 {dimension_numbers = #tpu.dot_dimension_numbers<[1], [0], [0], [1], [0, 0, 1, 1], [], []>} : vector<8x8xbf16>, vector<8x32xbf16>, vector<8x32xf32> -> vector<8x32xf32>
    %81 = arith.addf %54, %80 : vector<8x32xf32>
    %82 = vector.extract_strided_slice %31 {offsets = [0, 8], sizes = [8, 8], strides = [1, 1]} : vector<8x32xf32> to vector<8x8xf32>
    %83 = vector.extract_strided_slice %36 {offsets = [0, 8], sizes = [8, 8], strides = [1, 1]} : vector<8x32xf32> to vector<8x8xf32>
    %84 = vector.extract_strided_slice %41 {offsets = [0, 8], sizes = [8, 8], strides = [1, 1]} : vector<8x32xf32> to vector<8x8xf32>
    %85 = arith.truncf %82 : vector<8x8xf32> to vector<8x8xbf16>
    %86 = arith.truncf %83 : vector<8x8xf32> to vector<8x8xbf16>
    %cst_41 = arith.constant dense<0.000000e+00> : vector<8x8xf32>
    %87 = tpu.matmul %85, %86, %cst_41 {dimension_numbers = #tpu.dot_dimension_numbers<[1], [1], [0], [0], [0, 0, 1, 0], [], []>} : vector<8x8xbf16>, vector<8x8xbf16>, vector<8x8xf32> -> vector<8x8xf32>
    %cst_42 = arith.constant 0.353553385 : f32
    %88 = vector.broadcast %cst_42 : f32 to vector<8x8xf32>
    %89 = arith.mulf %87, %88 : vector<8x8xf32>
    %90 = arith.addf %89, %53 : vector<8x8xf32>
    %cst_43 = arith.constant dense<0xFF800000> : vector<8xf32>
    %91 = vector.multi_reduction <maximumf>, %90, %cst_43 [1] : vector<8x8xf32> to vector<8xf32>
    %92 = vector.shape_cast %91 : vector<8xf32> to vector<8x1xf32>
    %93 = vector.broadcast %92 : vector<8x1xf32> to vector<8x8xf32>
    %94 = arith.subf %90, %93 : vector<8x8xf32>
    %95 = math.exp %94 : vector<8x8xf32>
    %cst_44 = arith.constant dense<0.000000e+00> : vector<8xf32>
    %96 = vector.multi_reduction <add>, %95, %cst_44 [1] : vector<8x8xf32> to vector<8xf32>
    %97 = vector.shape_cast %96 : vector<8xf32> to vector<8x1xf32>
    %98 = tpu.reciprocal %97 {approx = true} : vector<8x1xf32> -> vector<8x1xf32>
    %99 = vector.broadcast %98 : vector<8x1xf32> to vector<8x8xf32>
    %100 = arith.mulf %95, %99 : vector<8x8xf32>
    %101 = arith.truncf %100 : vector<8x8xf32> to vector<8x8xbf16>
    %102 = arith.truncf %84 : vector<8x8xf32> to vector<8x8xbf16>
    %cst_45 = arith.constant dense<0.000000e+00> : vector<8x8xf32>
    %103 = tpu.matmul %101, %102, %cst_45 {dimension_numbers = #tpu.dot_dimension_numbers<[1], [0], [0], [1], [0, 0, 1, 1], [], []>} : vector<8x8xbf16>, vector<8x8xbf16>, vector<8x8xf32> -> vector<8x8xf32>
    %104 = arith.truncf %103 : vector<8x8xf32> to vector<8x8xbf16>
    %c1 = arith.constant 1 : index
    %c0_46 = arith.constant 0 : index
    %c0_47 = arith.constant 0 : index
    %105 = vector.load %arg13[%c1, %c0_46, %c0_47] : memref<4x8x32xbf16, #tpu.memory_space<vmem>>, vector<1x8x32xbf16>
    %106 = vector.shape_cast %105 : vector<1x8x32xbf16> to vector<8x32xbf16>
    %cst_48 = arith.constant dense<0.000000e+00> : vector<8x32xf32>
    %107 = tpu.matmul %104, %106, %cst_48 {dimension_numbers = #tpu.dot_dimension_numbers<[1], [0], [0], [1], [0, 0, 1, 1], [], []>} : vector<8x8xbf16>, vector<8x32xbf16>, vector<8x32xf32> -> vector<8x32xf32>
    %108 = arith.addf %81, %107 : vector<8x32xf32>
    %109 = vector.extract_strided_slice %31 {offsets = [0, 16], sizes = [8, 8], strides = [1, 1]} : vector<8x32xf32> to vector<8x8xf32>
    %110 = vector.extract_strided_slice %36 {offsets = [0, 16], sizes = [8, 8], strides = [1, 1]} : vector<8x32xf32> to vector<8x8xf32>
    %111 = vector.extract_strided_slice %41 {offsets = [0, 16], sizes = [8, 8], strides = [1, 1]} : vector<8x32xf32> to vector<8x8xf32>
    %112 = arith.truncf %109 : vector<8x8xf32> to vector<8x8xbf16>
    %113 = arith.truncf %110 : vector<8x8xf32> to vector<8x8xbf16>
    %cst_49 = arith.constant dense<0.000000e+00> : vector<8x8xf32>
    %114 = tpu.matmul %112, %113, %cst_49 {dimension_numbers = #tpu.dot_dimension_numbers<[1], [1], [0], [0], [0, 0, 1, 0], [], []>} : vector<8x8xbf16>, vector<8x8xbf16>, vector<8x8xf32> -> vector<8x8xf32>
    %cst_50 = arith.constant 0.353553385 : f32
    %115 = vector.broadcast %cst_50 : f32 to vector<8x8xf32>
    %116 = arith.mulf %114, %115 : vector<8x8xf32>
    %117 = arith.addf %116, %53 : vector<8x8xf32>
    %cst_51 = arith.constant dense<0xFF800000> : vector<8xf32>
    %118 = vector.multi_reduction <maximumf>, %117, %cst_51 [1] : vector<8x8xf32> to vector<8xf32>
    %119 = vector.shape_cast %118 : vector<8xf32> to vector<8x1xf32>
    %120 = vector.broadcast %119 : vector<8x1xf32> to vector<8x8xf32>
    %121 = arith.subf %117, %120 : vector<8x8xf32>
    %122 = math.exp %121 : vector<8x8xf32>
    %cst_52 = arith.constant dense<0.000000e+00> : vector<8xf32>
    %123 = vector.multi_reduction <add>, %122, %cst_52 [1] : vector<8x8xf32> to vector<8xf32>
    %124 = vector.shape_cast %123 : vector<8xf32> to vector<8x1xf32>
    %125 = tpu.reciprocal %124 {approx = true} : vector<8x1xf32> -> vector<8x1xf32>
    %126 = vector.broadcast %125 : vector<8x1xf32> to vector<8x8xf32>
    %127 = arith.mulf %122, %126 : vector<8x8xf32>
    %128 = arith.truncf %127 : vector<8x8xf32> to vector<8x8xbf16>
    %129 = arith.truncf %111 : vector<8x8xf32> to vector<8x8xbf16>
    %cst_53 = arith.constant dense<0.000000e+00> : vector<8x8xf32>
    %130 = tpu.matmul %128, %129, %cst_53 {dimension_numbers = #tpu.dot_dimension_numbers<[1], [0], [0], [1], [0, 0, 1, 1], [], []>} : vector<8x8xbf16>, vector<8x8xbf16>, vector<8x8xf32> -> vector<8x8xf32>
    %131 = arith.truncf %130 : vector<8x8xf32> to vector<8x8xbf16>
    %c2 = arith.constant 2 : index
    %c0_54 = arith.constant 0 : index
    %c0_55 = arith.constant 0 : index
    %132 = vector.load %arg13[%c2, %c0_54, %c0_55] : memref<4x8x32xbf16, #tpu.memory_space<vmem>>, vector<1x8x32xbf16>
    %133 = vector.shape_cast %132 : vector<1x8x32xbf16> to vector<8x32xbf16>
    %cst_56 = arith.constant dense<0.000000e+00> : vector<8x32xf32>
    %134 = tpu.matmul %131, %133, %cst_56 {dimension_numbers = #tpu.dot_dimension_numbers<[1], [0], [0], [1], [0, 0, 1, 1], [], []>} : vector<8x8xbf16>, vector<8x32xbf16>, vector<8x32xf32> -> vector<8x32xf32>
    %135 = arith.addf %108, %134 : vector<8x32xf32>
    %136 = vector.extract_strided_slice %31 {offsets = [0, 24], sizes = [8, 8], strides = [1, 1]} : vector<8x32xf32> to vector<8x8xf32>
    %137 = vector.extract_strided_slice %36 {offsets = [0, 24], sizes = [8, 8], strides = [1, 1]} : vector<8x32xf32> to vector<8x8xf32>
    %138 = vector.extract_strided_slice %41 {offsets = [0, 24], sizes = [8, 8], strides = [1, 1]} : vector<8x32xf32> to vector<8x8xf32>
    %139 = arith.truncf %136 : vector<8x8xf32> to vector<8x8xbf16>
    %140 = arith.truncf %137 : vector<8x8xf32> to vector<8x8xbf16>
    %cst_57 = arith.constant dense<0.000000e+00> : vector<8x8xf32>
    %141 = tpu.matmul %139, %140, %cst_57 {dimension_numbers = #tpu.dot_dimension_numbers<[1], [1], [0], [0], [0, 0, 1, 0], [], []>} : vector<8x8xbf16>, vector<8x8xbf16>, vector<8x8xf32> -> vector<8x8xf32>
    %cst_58 = arith.constant 0.353553385 : f32
    %142 = vector.broadcast %cst_58 : f32 to vector<8x8xf32>
    %143 = arith.mulf %141, %142 : vector<8x8xf32>
    %144 = arith.addf %143, %53 : vector<8x8xf32>
    %cst_59 = arith.constant dense<0xFF800000> : vector<8xf32>
    %145 = vector.multi_reduction <maximumf>, %144, %cst_59 [1] : vector<8x8xf32> to vector<8xf32>
    %146 = vector.shape_cast %145 : vector<8xf32> to vector<8x1xf32>
    %147 = vector.broadcast %146 : vector<8x1xf32> to vector<8x8xf32>
    %148 = arith.subf %144, %147 : vector<8x8xf32>
    %149 = math.exp %148 : vector<8x8xf32>
    %cst_60 = arith.constant dense<0.000000e+00> : vector<8xf32>
    %150 = vector.multi_reduction <add>, %149, %cst_60 [1] : vector<8x8xf32> to vector<8xf32>
    %151 = vector.shape_cast %150 : vector<8xf32> to vector<8x1xf32>
    %152 = tpu.reciprocal %151 {approx = true} : vector<8x1xf32> -> vector<8x1xf32>
    %153 = vector.broadcast %152 : vector<8x1xf32> to vector<8x8xf32>
    %154 = arith.mulf %149, %153 : vector<8x8xf32>
    %155 = arith.truncf %154 : vector<8x8xf32> to vector<8x8xbf16>
    %156 = arith.truncf %138 : vector<8x8xf32> to vector<8x8xbf16>
    %cst_61 = arith.constant dense<0.000000e+00> : vector<8x8xf32>
    %157 = tpu.matmul %155, %156, %cst_61 {dimension_numbers = #tpu.dot_dimension_numbers<[1], [0], [0], [1], [0, 0, 1, 1], [], []>} : vector<8x8xbf16>, vector<8x8xbf16>, vector<8x8xf32> -> vector<8x8xf32>
    %158 = arith.truncf %157 : vector<8x8xf32> to vector<8x8xbf16>
    %c3 = arith.constant 3 : index
    %c0_62 = arith.constant 0 : index
    %c0_63 = arith.constant 0 : index
    %159 = vector.load %arg13[%c3, %c0_62, %c0_63] : memref<4x8x32xbf16, #tpu.memory_space<vmem>>, vector<1x8x32xbf16>
    %160 = vector.shape_cast %159 : vector<1x8x32xbf16> to vector<8x32xbf16>
    %cst_64 = arith.constant dense<0.000000e+00> : vector<8x32xf32>
    %161 = tpu.matmul %158, %160, %cst_64 {dimension_numbers = #tpu.dot_dimension_numbers<[1], [0], [0], [1], [0, 0, 1, 1], [], []>} : vector<8x8xbf16>, vector<8x32xbf16>, vector<8x32xf32> -> vector<8x32xf32>
    %162 = arith.addf %135, %161 : vector<8x32xf32>
    %163 = arith.addf %1, %162 : vector<8x32xf32>
    %c0_65 = arith.constant 0 : index
    %c0_66 = arith.constant 0 : index
    %164 = vector.load %arg14[%c0_65, %c0_66] : memref<1x32xf32, #tpu.memory_space<vmem>>, vector<1x32xf32>
    %165 = vector.broadcast %164 : vector<1x32xf32> to vector<8x32xf32>
    %166 = arith.addf %163, %165 : vector<8x32xf32>
    %c0_67 = arith.constant 0 : index
    %c0_68 = arith.constant 0 : index
    %167 = vector.load %arg15[%c0_67, %c0_68] : memref<1x32xf32, #tpu.memory_space<vmem>>, vector<1x32xf32>
    %c0_69 = arith.constant 0 : index
    %c0_70 = arith.constant 0 : index
    %168 = vector.load %arg16[%c0_69, %c0_70] : memref<1x32xf32, #tpu.memory_space<vmem>>, vector<1x32xf32>
    %cst_71 = arith.constant dense<0.000000e+00> : vector<8xf32>
    %169 = vector.multi_reduction <add>, %166, %cst_71 [1] : vector<8x32xf32> to vector<8xf32>
    %170 = vector.shape_cast %169 : vector<8xf32> to vector<8x1xf32>
    %cst_72 = arith.constant 3.200000e+01 : f32
    %171 = vector.broadcast %cst_72 : f32 to vector<8x1xf32>
    %172 = arith.divf %170, %171 : vector<8x1xf32>
    %173 = vector.broadcast %172 : vector<8x1xf32> to vector<8x32xf32>
    %174 = arith.subf %166, %173 : vector<8x32xf32>
    %175 = arith.mulf %174, %174 : vector<8x32xf32>
    %cst_73 = arith.constant dense<0.000000e+00> : vector<8xf32>
    %176 = vector.multi_reduction <add>, %175, %cst_73 [1] : vector<8x32xf32> to vector<8xf32>
    %177 = vector.shape_cast %176 : vector<8xf32> to vector<8x1xf32>
    %cst_74 = arith.constant 3.200000e+01 : f32
    %178 = vector.broadcast %cst_74 : f32 to vector<8x1xf32>
    %179 = arith.divf %177, %178 : vector<8x1xf32>
    %180 = vector.broadcast %172 : vector<8x1xf32> to vector<8x32xf32>
    %181 = arith.subf %166, %180 : vector<8x32xf32>
    %cst_75 = arith.constant 9.99999974E-6 : f32
    %182 = vector.broadcast %cst_75 : f32 to vector<8x1xf32>
    %183 = arith.addf %179, %182 : vector<8x1xf32>
    %184 = math.rsqrt %183 : vector<8x1xf32>
    %185 = vector.broadcast %184 : vector<8x1xf32> to vector<8x32xf32>
    %186 = arith.mulf %181, %185 : vector<8x32xf32>
    %187 = vector.broadcast %167 : vector<1x32xf32> to vector<8x32xf32>
    %188 = arith.mulf %186, %187 : vector<8x32xf32>
    %189 = vector.broadcast %168 : vector<1x32xf32> to vector<8x32xf32>
    %190 = arith.addf %188, %189 : vector<8x32xf32>
    %191 = arith.truncf %190 : vector<8x32xf32> to vector<8x32xbf16>
    %cst_76 = arith.constant 0.000000e+00 : f32
    %192 = vector.broadcast %cst_76 : f32 to vector<8x32xf32>
    %c0_77 = arith.constant 0 : index
    %c0_78 = arith.constant 0 : index
    %193 = vector.load %arg17[%c0_77, %c0_78] : memref<32x64xbf16, #tpu.memory_space<vmem>>, vector<32x64xbf16>
    %cst_79 = arith.constant dense<0.000000e+00> : vector<8x64xf32>
    %194 = tpu.matmul %191, %193, %cst_79 {dimension_numbers = #tpu.dot_dimension_numbers<[1], [0], [0], [1], [0, 0, 1, 1], [], []>} : vector<8x32xbf16>, vector<32x64xbf16>, vector<8x64xf32> -> vector<8x64xf32>
    %c0_80 = arith.constant 0 : index
    %c0_81 = arith.constant 0 : index
    %195 = vector.load %arg18[%c0_80, %c0_81] : memref<1x64xf32, #tpu.memory_space<vmem>>, vector<1x64xf32>
    %196 = vector.broadcast %195 : vector<1x64xf32> to vector<8x64xf32>
    %197 = arith.addf %194, %196 : vector<8x64xf32>
    %cst_82 = arith.constant 5.000000e-01 : f32
    %198 = vector.broadcast %cst_82 : f32 to vector<8x64xf32>
    %199 = arith.mulf %198, %197 : vector<8x64xf32>
    %cst_83 = arith.constant 0.707106769 : f32
    %200 = vector.broadcast %cst_83 : f32 to vector<8x64xf32>
    %201 = arith.mulf %197, %200 : vector<8x64xf32>
    %202 = math.erf %201 : vector<8x64xf32>
    %cst_84 = arith.constant 1.000000e+00 : f32
    %203 = vector.broadcast %cst_84 : f32 to vector<8x64xf32>
    %204 = arith.addf %203, %202 : vector<8x64xf32>
    %205 = arith.mulf %199, %204 : vector<8x64xf32>
    %206 = arith.truncf %205 : vector<8x64xf32> to vector<8x64xbf16>
    %c0_85 = arith.constant 0 : index
    %c0_86 = arith.constant 0 : index
    %207 = vector.load %arg19[%c0_85, %c0_86] : memref<64x32xbf16, #tpu.memory_space<vmem>>, vector<64x32xbf16>
    %cst_87 = arith.constant dense<0.000000e+00> : vector<8x32xf32>
    %208 = tpu.matmul %206, %207, %cst_87 {dimension_numbers = #tpu.dot_dimension_numbers<[1], [0], [0], [1], [0, 0, 1, 1], [], []>} : vector<8x64xbf16>, vector<64x32xbf16>, vector<8x32xf32> -> vector<8x32xf32>
    %209 = arith.addf %192, %208 : vector<8x32xf32>
    %210 = arith.addf %166, %209 : vector<8x32xf32>
    %c0_88 = arith.constant 0 : index
    %c0_89 = arith.constant 0 : index
    %211 = vector.load %arg20[%c0_88, %c0_89] : memref<1x32xf32, #tpu.memory_space<vmem>>, vector<1x32xf32>
    %212 = vector.broadcast %211 : vector<1x32xf32> to vector<8x32xf32>
    %213 = arith.addf %210, %212 : vector<8x32xf32>
    %c0_90 = arith.constant 0 : index
    %c0_91 = arith.constant 0 : index
    %c0_92 = arith.constant 0 : index
    %214 = vector.load %arg21[%c0_90, %c0_91, %c0_92] : memref<1x8x32xf32, #tpu.memory_space<vmem>>, vector<1x8x32xf32>
    %215 = vector.shape_cast %214 : vector<1x8x32xf32> to vector<8x32xf32>
    %216 = vector.shape_cast %213 : vector<8x32xf32> to vector<1x8x32xf32>
    tpu.vector_store %arg21[%c0_90, %c0_91, %c0_92], %216 {strides = array<i32>} : memref<1x8x32xf32, #tpu.memory_space<vmem>>, vector<1x8x32xf32>,
    return
  }
  func.func @transform_0(%arg0: i32) -> (i32, i32, i32) {
    %c0_i32 = arith.constant 0 : i32
    %c0_i32_0 = arith.constant 0 : i32
    %c0_i32_1 = arith.constant 0 : i32
    return %arg0, %c0_i32, %c0_i32_0 : i32, i32, i32
  }
  func.func @transform_1(%arg0: i32) -> (i32, i32, i32) {
    %c0_i32 = arith.constant 0 : i32
    %c0_i32_0 = arith.constant 0 : i32
    %c0_i32_1 = arith.constant 0 : i32
    return %arg0, %c0_i32, %c0_i32_0 : i32, i32, i32
  }
  func.func @transform_2(%arg0: i32) -> (i32, i32) {
    %c0_i32 = arith.constant 0 : i32
    %c0_i32_0 = arith.constant 0 : i32
    %c0_i32_1 = arith.constant 0 : i32
    return %c0_i32, %c0_i32_0 : i32, i32
  }
  func.func @transform_3(%arg0: i32) -> (i32, i32) {
    %c0_i32 = arith.constant 0 : i32
    %c0_i32_0 = arith.constant 0 : i32
    %c0_i32_1 = arith.constant 0 : i32
    return %c0_i32, %c0_i32_0 : i32, i32
  }
  func.func @transform_4(%arg0: i32) -> (i32, i32) {
    %c0_i32 = arith.constant 0 : i32
    %c0_i32_0 = arith.constant 0 : i32
    %c0_i32_1 = arith.constant 0 : i32
    return %c0_i32, %c0_i32_0 : i32, i32
  }
  func.func @transform_5(%arg0: i32) -> (i32, i32) {
    %c0_i32 = arith.constant 0 : i32
    %c0_i32_0 = arith.constant 0 : i32
    %c0_i32_1 = arith.constant 0 : i32
    return %c0_i32, %c0_i32_0 : i32, i32
  }
  func.func @transform_6(%arg0: i32) -> (i32, i32) {
    %c0_i32 = arith.constant 0 : i32
    %c0_i32_0 = arith.constant 0 : i32
    %c0_i32_1 = arith.constant 0 : i32
    return %c0_i32, %c0_i32_0 : i32, i32
  }
  func.func @transform_7(%arg0: i32) -> (i32, i32) {
    %c0_i32 = arith.constant 0 : i32
    %c0_i32_0 = arith.constant 0 : i32
    %c0_i32_1 = arith.constant 0 : i32
    return %c0_i32, %c0_i32_0 : i32, i32
  }
  func.func @transform_8(%arg0: i32) -> (i32, i32) {
    %c0_i32 = arith.constant 0 : i32
    %c0_i32_0 = arith.constant 0 : i32
    %c0_i32_1 = arith.constant 0 : i32
    return %c0_i32, %c0_i32_0 : i32, i32
  }
  func.func @transform_9(%arg0: i32) -> (i32, i32) {
    %c0_i32 = arith.constant 0 : i32
    %c0_i32_0 = arith.constant 0 : i32
    %c0_i32_1 = arith.constant 0 : i32
    return %c0_i32, %c0_i32_0 : i32, i32
  }
  func.func @transform_10(%arg0: i32) -> (i32, i32) {
    %c0_i32 = arith.constant 0 : i32
    %c0_i32_0 = arith.constant 0 : i32
    %c0_i32_1 = arith.constant 0 : i32
    return %c0_i32, %c0_i32_0 : i32, i32
  }
  func.func @transform_11(%arg0: i32) -> (i32, i32) {
    %c0_i32 = arith.constant 0 : i32
    %c0_i32_0 = arith.constant 0 : i32
    %c0_i32_1 = arith.constant 0 : i32
    return %c0_i32, %c0_i32_0 : i32, i32
  }
  func.func @transform_12(%arg0: i32) -> (i32, i32, i32) {
    %c0_i32 = arith.constant 0 : i32
    %c0_i32_0 = arith.constant 0 : i32
    %c0_i32_1 = arith.constant 0 : i32
    %c0_i32_2 = arith.constant 0 : i32
    return %c0_i32, %c0_i32_0, %c0_i32_1 : i32, i32, i32
  }
  func.func @transform_13(%arg0: i32) -> (i32, i32) {
    %c0_i32 = arith.constant 0 : i32
    %c0_i32_0 = arith.constant 0 : i32
    %c0_i32_1 = arith.constant 0 : i32
    return %c0_i32, %c0_i32_0 : i32, i32
  }
  func.func @transform_14(%arg0: i32) -> (i32, i32) {
    %c0_i32 = arith.constant 0 : i32
    %c0_i32_0 = arith.constant 0 : i32
    %c0_i32_1 = arith.constant 0 : i32
    return %c0_i32, %c0_i32_0 : i32, i32
  }
  func.func @transform_15(%arg0: i32) -> (i32, i32) {
    %c0_i32 = arith.constant 0 : i32
    %c0_i32_0 = arith.constant 0 : i32
    %c0_i32_1 = arith.constant 0 : i32
    return %c0_i32, %c0_i32_0 : i32, i32
  }
  func.func @transform_16(%arg0: i32) -> (i32, i32) {
    %c0_i32 = arith.constant 0 : i32
    %c0_i32_0 = arith.constant 0 : i32
    %c0_i32_1 = arith.constant 0 : i32
    return %c0_i32, %c0_i32_0 : i32, i32
  }
  func.func @transform_17(%arg0: i32) -> (i32, i32) {
    %c0_i32 = arith.constant 0 : i32
    %c0_i32_0 = arith.constant 0 : i32
    %c0_i32_1 = arith.constant 0 : i32
    return %c0_i32, %c0_i32_0 : i32, i32
  }
  func.func @transform_18(%arg0: i32) -> (i32, i32) {
    %c0_i32 = arith.constant 0 : i32
    %c0_i32_0 = arith.constant 0 : i32
    %c0_i32_1 = arith.constant 0 : i32
    return %c0_i32, %c0_i32_0 : i32, i32
  }
  func.func @transform_19(%arg0: i32) -> (i32, i32) {
    %c0_i32 = arith.constant 0 : i32
    %c0_i32_0 = arith.constant 0 : i32
    %c0_i32_1 = arith.constant 0 : i32
    return %c0_i32, %c0_i32_0 : i32, i32
  }
  func.func @transform_20(%arg0: i32) -> (i32, i32, i32) {
    %c0_i32 = arith.constant 0 : i32
    %c0_i32_0 = arith.constant 0 : i32
    %c0_i32_1 = arith.constant 0 : i32
    return %arg0, %c0_i32, %c0_i32_0 : i32, i32, i32
  }
}

</mosaic_0001>

<bundles_post_ra>
// kernel: tpu_custom_call.1
= control target key start
LH: loop header
LB: loop body
LE: loop exit
PB: predicated region body
PF: predicated region fallthrough
CT: control target
= control target key end

     0   :  { %s2534_s0 = inlined_call_operand.vmem [shape: f32[2,8,32], index: 0, kind: input, shape index: {}]   ;;  %s2535_s1 = inlined_call_operand.hbm [shape: f32[2,1,8], index: 1, kind: input, shape index: {}]   ;;  %s2536_s2 = inlined_call_operand.vmem [shape: f32[8,4], index: 2, kind: input, shape index: {}]   ;;  %s2537_s3 = inlined_call_operand.vmem [shape: f32[8,4], index: 3, kind: input, shape index: {}]   ;;  %s2538_s4 = inlined_call_operand.hbm [shape: f32[1,32], index: 4, kind: input, shape index: {}]   ;;  %s2539_s5 = inlined_call_operand.hbm [shape: f32[1,32], index: 5, kind: input, shape index: {}]   ;;  %s2540_s6 = inlined_call_operand.vmem [shape: bf16[32,32], index: 6, kind: input, shape index: {}]   ;;  %s2541_s7 = inlined_call_operand.hbm [shape: f32[1,32], index: 7, kind: input, shape index: {}]   ;;  %s2542_s8 = inlined_call_operand.vmem [shape: bf16[32,32], index: 8, kind: input, shape index: {}]   ;;  %s2543_s9 = inlined_call_operand.hbm [shape: f32[1,32], index: 9, kind: input, shape index: {}]   ;;  %s2544_s10 = inlined_call_operand.vmem [shape: bf16[32,32], index: 10, kind: input, shape index: {}]   ;;  %s2545_s11 = inlined_call_operand.vmem [shape: f32[1,32], index: 11, kind: input, shape index: {}]   ;;  %s2546_s12 = inlined_call_operand.hbm [shape: bf16[4,8,32], index: 12, kind: input, shape index: {}]   ;;  %s2547_s13 = inlined_call_operand.vmem [shape: f32[1,32], index: 13, kind: input, shape index: {}]   ;;  %s2548_s14 = inlined_call_operand.vmem [shape: f32[1,32], index: 14, kind: input, shape index: {}]   ;;  %s2549_s15 = inlined_call_operand.vmem [shape: f32[1,32], index: 15, kind: input, shape index: {}]   ;;  %s2550_s16 = inlined_call_operand.hbm [shape: bf16[32,64], index: 16, kind: input, shape index: {}]   ;;  %s2551_s17 = inlined_call_operand.vmem [shape: f32[1,64], index: 17, kind: input, shape index: {}]   ;;  %s2552_s18 = inlined_call_operand.vmem [shape: bf16[64,32], index: 18, kind: input, shape index: {}]   ;;  %s2553_s19 = inlined_call_operand.vmem [shape: f32[1,32], index: 19, kind: input, shape index: {}]   ;;  %s2554_s20 = inlined_call_operand.hbm [shape: f32[2,8,32], index: 20, kind: output, shape index: {}]  }
   0x1   :  { %2558 = sst [smem:[#allocation20_spill]] %s2534_s0 }
   0x2   :  { %2559 = sst [smem:[#allocation21_spill]] %s2535_s1 }
   0x3   :  { %2560 = sst [smem:[#allocation22_spill]] %s2538_s4 }
   0x4   :  { %2561 = sst [smem:[#allocation23_spill]] %s2539_s5 }
   0x5   :  { %2562 = sst [smem:[#allocation24_spill]] %s2540_s6 }
   0x6   :  { %2563 = sst [smem:[#allocation25_spill]] %s2541_s7 }
   0x7   :  { %2564 = sst [smem:[#allocation26_spill]] %s2543_s9 }
   0x8   :  { %2565 = sst [smem:[#allocation27_spill]] %s2546_s12 }
   0x9   :  { %2566 = sst [smem:[#allocation28_spill]] %s2549_s15 }
   0xa   :  { %2567 = sst [smem:[#allocation29_spill]] %s2551_s17 }
   0xb   :  { %2568 = sst [smem:[#allocation30_spill]] %s2552_s18 }
   0xc   :  { %2569 = sst [smem:[#allocation31_spill]] %s2553_s19 }
   0xd   :  { %2570 = sst [smem:[#allocation32_spill]] %s2554_s20 }
   0xe   :  { %25 = vsyncpa [#allocation3], 0 }
   0xf   :  { %27 = vsyncpa [#allocation3 + $0x1], 0 }
  0x10   :  { %28 = vsyncpa [#allocation6], 0 }
  0x11   :  { %29 = vsyncpa [#allocation9], 0 }
  0x12   :  { %30 = vsyncpa [#allocation12], 0 }
  0x13   :  { %31 = vsyncpa [#allocation4], 0 }
  0x14   :  { %33 = vsyncpa [#allocation4 + $0x1], 0  ;;  %s2216_s1 = smov 0   ;;  %s2218_s22 = smov 0  }
  0x15   :  { %s2220_s23 = smov 0   ;;  %s2222_s24 = smov 0  }
  0x16 LB: > { %s2571_s26 = sld [smem:[#allocation22_spill]]  ;;  %s2240_s27 = sadd.s32 4294967295, %s2095_s24   ;;  %s2095_s24 = sphi %s2222_s24, %s2595_s24   ;;  %s2091_s23 = sphi %s2220_s23, %s2594_s23   ;;  %s2087_s22 = sphi %s2218_s22, %s2593_s22   ;;  %s2083_s1 = sphi %s2216_s1, %s2592_s1  }
  0x17   : > { %p1559_p0 = scmp.ge.s32.totalorder %s2095_s24, 1  ;;  %p86_p1 = scmp.eq.s32.totalorder %s2240_s27, 0 }
  0x18   : > { %p500_p2 = scmp.lt.s32.totalorder %s2095_s24, 3  ;;  %s2097_s4 = smov [#allocation5]  }
  0x19   : > { %s520_s29 = sshll.u32 %s2097_s4, 4  ;;  %s2573_s7 = sld [smem:[#allocation25_spill]]  ;;  %s521_s29 = int_to_ptr.vmem [resolvable:$true] %s520_s29 }
  0x1a   : > { %p2245_p3 = pnand %p1559_p0, %p500_p2  ;;  %s2098_s25 = smov [#allocation8]  }
  0x1b   : > { %s2575_s12 = sld [smem:[#allocation27_spill]]  ;;  %s2099_s30 = smov [#allocation11]  }
  0x1c   : > { %s518_s3 = sshll.u32 %s2571_s26, 4  ;;  %p1686_p5 = pneg %p2245_p3  ;;  %s519_s3 = int_to_ptr.hbm [resolvable:$true] %s518_s3 }
  0x1d   : > { %s547_s26 = sshll.u32 %s2098_s25, 4  ;;  %s579_s0 = sshll.u32 %s2099_s30, 4  ;;  %s548_s26 = int_to_ptr.vmem [resolvable:$true] %s547_s26  ;;  %s580_s0 = int_to_ptr.vmem [resolvable:$true] %s579_s0 }
  0x1e   : > { %p2257_p6 = pnand %p1686_p5, %p86_p1  ;;  %s2576_s5 = sld [smem:[#allocation23_spill]] }
  0x1f   : > { %s545_s21 = sshll.u32 %s2573_s7, 4  ;;  %s2100_s25 = smov 64   ;;  %s546_s21 = int_to_ptr.hbm [resolvable:$true] %s545_s21 }
  0x20   : > { %1689 = dma.hbm_to_vmem [thread:$0]  (!%p2257_p6), %s519_s3, 16, %s521_s29, [#allocation6]  }
  0x21   : > { %s577_s20 = sshll.u32 %s2575_s12, 4  ;;  %s2101_s15 = smov 4   ;;  %s578_s20 = int_to_ptr.hbm [resolvable:$true] %s577_s20 }
  0x22   : > { %1695 = dma.hbm_to_vmem [thread:$0]  (!%p2257_p6), %s546_s21, 16, %s548_s26, [#allocation9]  }
  0x23   : > { %1701 = dma.hbm_to_vmem [thread:$0]  (!%p2257_p6), %s578_s20, 256, %s580_s0, [#allocation12], %s2100_s25, %s2100_s25, %s2101_s15  }
  0x24   : > { %s530_s17 = sshll.u32 %s2576_s5, 4  ;;  %s2102_s19 = smov [#allocation7]   ;;  %s531_s17 = int_to_ptr.hbm [resolvable:$true] %s530_s17 }
  0x25   : > { %s532_s4 = sshll.u32 %s2102_s19, 4  ;;  %s2577_s9 = sld [smem:[#allocation26_spill]]  ;;  %s533_s4 = int_to_ptr.vmem [resolvable:$true] %s532_s4 }
  0x26   : > { %1692 = dma.hbm_to_vmem [thread:$0]  (!%p2257_p6), %s531_s17, 16, %s533_s4, [#allocation6]  }
  0x27   : > { %s600_s20 = sshll.u32 %s2550_s16, 4  ;;  %s2103_s26 = smov [#allocation10]   ;;  %s601_s20 = int_to_ptr.hbm [resolvable:$true] %s600_s20 }
  0x28   : > { %s562_s30 = sshll.u32 %s2103_s26, 4  ;;  %s2104_s0 = smov [#allocation13]   ;;  %s563_s30 = int_to_ptr.vmem [resolvable:$true] %s562_s30 }
  0x29   : > { %s602_s17 = sshll.u32 %s2104_s0, 4  ;;  %s1558_s19 = sadd.s32 4294967294, %s2095_s24   ;;  %s603_s17 = int_to_ptr.vmem [resolvable:$true] %s602_s17 }
  0x2a   : > { %1704 = dma.hbm_to_vmem [thread:$0]  (!%p2257_p6), %s601_s20, 256, %s603_s17, [#allocation12], %s2100_s25, %s2100_s25, %s2101_s15  }
  0x2b   : > { %s560_s21 = sshll.u32 %s2577_s9, 4  ;;  %s2287_s4 = sadd.s32 1, %s2095_s24   ;;  %s561_s21 = int_to_ptr.hbm [resolvable:$true] %s560_s21 }
  0x2c   : > { %1698 = dma.hbm_to_vmem [thread:$0]  (!%p2257_p6), %s561_s21, 16, %s563_s30, [#allocation9]  }
  0x2d   : > { %s69_s3 = ssub.s32 %s2095_s24, %s2287_s4  ;;  %s72_s29 = sadd.s32 1, %s2091_s23 }
  0x2e   : > { %p70_p7 = scmp.eq.s32.totalorder %s69_s3, 0  ;;  %p79_p8 = scmp.ne.s32.totalorder %s2091_s23, %s2087_s22 }
  0x2f   : > { %p80_p9 = scmp.eq.s32.totalorder %s2095_s24, 0  ;;  %p85_p10 = scmp.ne.s32.totalorder %s2087_s22, %s2083_s1 }
  0x30   : > { %s2298_s21 = scalar_select %p70_p7, %s2091_s23, %s72_s29  }
  0x31   : > { %p2300_p11 = por %p80_p9, %p79_p8  ;;  %p2306_p12 = por %p86_p1, %p85_p10 }
  0x32   : > { %p487_p13 = scmp.eq.s32.totalorder %s2240_s27, 1  ;;  %p493_p0 = scmp.eq.s32.totalorder %s1558_s19, 1 }
  0x33   : > { %p1719_p2 = scmp.lt.s32.totalorder %s2095_s24, 2  ;;  %s632_s2 = sand.u32 1, %s2091_s23  }
  0x34   : > { %p2313_p5 = por %p487_p13, %p79_p8  ;;  %p2317_p6 = por %p493_p0, %p85_p10 }
  0x35   : > { %s2582_s30 = sld [smem:[#allocation21_spill]]  ;;  %s635_s17 = scalar_lea.vmem [#allocation2], %s632_s2 }
  0x36   : > { %s642_s3 = sshll.u32 %s635_s17, 4  ;;  %p2327_p7 = pnand %p1719_p2, %p2300_p11  ;;  %s643_s3 = int_to_ptr.vmem [resolvable:$true] %s642_s3 }
  0x37   : > { %s633_s5 = scalar_lea.sflag [#allocation3], %s632_s2 }
  0x38   : > { %p1991_p9 = pneg %p2327_p7 }
  0x3b   : > { %s638_s0 = scalar_lea.hbm %s2582_s30, %s2095_s24 }
  0x3c   : > { %s640_s29 = sshll.u32 %s638_s0, 4  ;;  %s1994_s0 = scalar_lea.hbm %s2582_s30, 2  ;;  %s641_s29 = int_to_ptr.hbm [resolvable:$true] %s640_s29 }
  0x3d   : > { %s1987_s9 = sshra.s32 %s641_s29, 4  ;;  %s1988_s9 = int_to_ptr.hbm [resolvable:$true] %s1987_s9 }
  0x3e   : > { %s1989_s12 = scalar_lea.hbm %s1988_s9, 1  ;;  %p1995_p11 = scmp.lt.s32.totalorder %s1988_s9, %s2582_s30 }
  0x3f   : > { %p1990_p8 = scmp.ne.s32.totalorder %s1988_s9, %s1989_s12  ;;  %p1996_p0 = scmp.lt.s32.totalorder %s1994_s0, %s1989_s12 }
  0x41   : > { %p1992_p10 = pnand %p1991_p9, %p1990_p8  ;;  %p1997_p2 = por %p1996_p0, %p1995_p11 }
  0x43   : > { %p1993_p13 = pneg %p1992_p10 }
  0x45   : > { %p1998_p4 = pnand %p1997_p2, %p1993_p13 }
  0x47   : > { %2001 = shalt.err (!%p1998_p4)
}
  0x48   : > { %1708 = dma.hbm_to_vmem [thread:$0]  (!%p2327_p7), %s641_s29, 16, %s643_s3, %s633_s5  }
  0x49   : > { %651 = sbr.rel (%p2245_p3) target bundleno = 2282 (0x8ea), region = 100  ;;  %s2344_s2 = sand.u32 (!%p2245_p3), 1, %s2087_s22  }
  0x4a   : > { %s654_s20 = scalar_lea.sflag (!%p2245_p3), [#allocation3], %s2344_s2  ;;  %s656_s26 = scalar_lea.vmem (!%p2245_p3), [#allocation2], %s2344_s2 }
  0x4e   : > { %2062 = dma.done.wait (%p2306_p12), %s654_s20, 16  }
  0x4f   : > { %2064 = vsyncadd (%p2306_p12), %s654_s20, 4294967280 }
  0x50   : > { %2066 = dma.done.wait (%p86_p1), [#allocation6], 32  }
  0x51   : > { %2068 = vsyncadd (%p86_p1), [#allocation6], 4294967264 }
  0x52   : > { %2070 = dma.done.wait (%p86_p1), [#allocation9], 32  }
  0x53   : > { %2072 = vsyncadd (%p86_p1), [#allocation9], 4294967264 }
  0x54   : > { %2074 = dma.done.wait (%p86_p1), [#allocation12], 512  }
  0x55   : > { %2076 = vsyncadd (%p86_p1), [#allocation12], 4294966784  ;;  %p747_p3 = scmp.lt.s32.totalorder %s2240_s27, 1  ;;  %s2584_s15 = sld [smem:[#allocation20_spill]]  ;;  %vm755_vm0 = vcmask 261120   ;;  %v2105_v2 = vmov 32.0   ;;  %v896_v59 = vlaneseq }
  0x56   : > { %1783 = vrcp.f32 %v2105_v2  ;;  %s2585_s6 = sld [smem:[#allocation24_spill]]  ;;  %v1649_v15 = vld [vmem:[%s2542_s8 + $0x8] sm:$0xff]  ;;  %v1648_v18 = vld [vmem:[%s2542_s8] sm:$0xff]  ;;  %vm910_vm5 = vcmask 64512   ;;  %s2106_s0 = smov 112   ;;  %vm948_vm6 = vcmask 1043456  }
  0x57   : > { %s748_s5 = scalar_select %p747_p3, %s2240_s27, 1  ;;  %v1651_v16 = vld [vmem:[%s2544_s10 + $0x8] sm:$0xff]  ;;  %856 = vmatpush.bf16.msra.mxu1 %v1649_v15  ;;  %v1650_v19 = vld [vmem:[%s2544_s10] sm:$0xff]  ;;  %v2109_v60 = vmov 0   ;;  %v897_v62 = vshrl.u32 %v896_v59, 7  ;;  %v899_v63 = vand.u32 127, %v896_v59 }
  0x58   : > { %889 = vmatpush.bf16.msra.mxu2 %v1651_v16  ;;  %v1773_v29 = vld [vmem:[#allocation5] ss:$0 sm:$0xff]  ;;  %v1774_v32 = vld [vmem:[#allocation7] ss:$0 sm:$0xff]  ;;  %v1776_v36 = vld [vmem:[#allocation10] ss:$0 sm:$0xff] }
  0x59   : > { %s1575_s9 = sshll.u32 %s748_s5, 3  ;;  %v1775_v40 = vld [vmem:[#allocation8] ss:$0 sm:$0xff]  ;;  %v1777_v42 = vld [vmem:[%s2545_s11] ss:$0 sm:$0xff]  ;;  %s2107_s17 = smov 120   ;;  %vm901_vm8 = vcmp.gt.s32.totalorder %v899_v63, %v897_v62 }
  0x5a   : > { %s2108_s7 = smov 104   ;;  %v900_v58 = vld [vmem:[%s656_s26] sm:$0x1]  ;;  %v1030_v62 = vld [vmem:[#allocation11 + $0x4] sm:$0xf]  ;;  %s2587_s19 = sld [smem:[#allocation29_spill]] }
  0x5b   : > { %s750_s3 = scalar_lea.vmem %s2584_s15, %s1575_s9  ;;  %857 = vmatpush.bf16.msra.mxu1 %v1648_v18  ;;  %vm902_vm7 = vcmp.lt.f32.partialorder %v900_v58, 0.5  ;;  %v1035_v63 = vsel %vm948_vm6, %v1030_v62, 0  ;;  %s2586_s15 = sld [smem:[#allocation28_spill]] }
  0x5c   : > { %v2369_v0 = vld [vmem:[%s750_s3] sm:$0xff]  ;;  %v1784_v3 = vpop.eup %1783  ;;  %v1647_v14 = vld [vmem:[%s2585_s6 + $0x8] sm:$0xff]  ;;  %890 = vmatpush.bf16.msra.mxu2 %v1650_v19  ;;  %v903_v61 = vsel %vm902_vm7, 1, %v2109_v60  ;;  %s1643_s3 = sshll.u32 %s2240_s27, 3  ;;  %s2590_s5 = sld [smem:[#allocation31_spill]] }
  0x5d   : > { %v756_v1 = vsel %vm755_vm0, %v2369_v0, 0.0  ;;  %v760_v4 = vmul.f32 32.0, %v1784_v3  ;;  %vm764_vm1 = vweird.f32 %v1784_v3  ;;  %823 = vmatpush.bf16.msra.mxu0 %v1647_v14  ;;  %v1646_v17 = vld [vmem:[%s2585_s6] sm:$0xff]  ;;  %s1408_s27 = scalar_lea.sflag [#allocation4], %s2344_s2 }
  0x5e   : > { %757 = vadd.xlane.f32.xlu0 %v756_v1  ;;  %v904_v1 = vperm.slane %v903_v61, 0 }
  0x5f   : > { %v761_v5 = vsub.f32 1.0, %v760_v4 }
  0x60   : > { %vm905_vm9 = vcmp.eq.s32.totalorder %v904_v1, 1 }
  0x61   : > { %v762_v6 = vmul.f32 %v1784_v3, %v761_v5  ;;  %824 = vmatpush.bf16.msra.mxu0 %v1646_v17  ;;  %vm906_vm10 = vmor %vm901_vm8, %vm905_vm9 }
  0x63   : > { %v763_v7 = vadd.f32 %v1784_v3, %v762_v6 }
  0x65   : > { %v2373_v8 = vsel %vm764_vm1, %v1784_v3, %v763_v7  ;;  %v2110_v3 = vmov 0.0  }
  0x66   : > { %v2419_v4 = vsel %vm906_vm10, -1e+30, %v2110_v3 }
  0xd1   : > { %v758_v9 = vpop.xlane.xlu0 %757 }
  0xd2   : > { %v766_v10 = vmul.f32 %v2373_v8, %v758_v9 }
  0xd4   : > { %v767_v11 = vsub.f32 %v2369_v0, %v766_v10 }
  0xd6   : > { %v768_v12 = vmul.f32 %v767_v11, %v767_v11 }
  0xd8   : > { %v769_v13 = vsel %vm755_vm0, %v768_v12, 0.0 }
  0xd9   : > { %770 = vadd.xlane.f32.xlu0 %v769_v13 }
 0x14c   : > { %v771_v20 = vpop.xlane.xlu0 %770 }
 0x14d   : > { %v772_v21 = vmul.f32 %v771_v20, %v2373_v8 }
 0x14f   : > { %v773_v22 = vadd.f32 1e-05, %v772_v21 }
 0x151   : > { %1785 = vrsqrt.f32 %v773_v22  ;;  %vm780_vm3 = vweird.f32 %v773_v22 }
 0x157   : > { %v1786_v23 = vpop.eup %1785 }
 0x158   : > { %v775_v24 = vmul.f32 %v1786_v23, %v773_v22  ;;  %vm781_vm2 = vweird.f32 %v1786_v23 }
 0x159   : > { %vm782_vm4 = vmor %vm780_vm3, %vm781_vm2  ;;  %vm1383_vm3 = vcmask 523264  }
 0x15a   : > { %v776_v25 = vmul.f32 %v1786_v23, %v775_v24 }
 0x15c   : > { %v777_v26 = vmul.f32 0.5, %v776_v25 }
 0x15e   : > { %v778_v27 = vsub.f32 1.5, %v777_v26 }
 0x160   : > { %v779_v28 = vmul.f32 %v1786_v23, %v778_v27  ;;  %v966_v27 = vld [vmem:[#allocation11] sm:$0xf] }
 0x162   : > { %v783_v30 = vsel %vm782_vm4, %v1786_v23, %v779_v28  ;;  %v1054_v28 = vsel %vm948_vm6, %v966_v27, 0 }
 0x163   : > { %v784_v31 = vmul.f32 %v783_v30, %v767_v11 }
 0x165   : > { %v788_v33 = vmul.f32 %v1773_v29, %v784_v31 }
 0x167   : > { %v792_v34 = vadd.f32 %v1774_v32, %v788_v33 }
 0x169   : > { %v793_v35 = vpack.c.bf16 %v792_v34, %v792_v34 }
 0x16b   : > { %1584 = vmatmul.msk.bf16.vlgmr.msra.gmra.mxu0 %vm755_vm0, %v793_v35  ;;  %1593 = vmatmul.msk.bf16.vlgmr.msra.gmra.mxu1 %vm755_vm0, %v793_v35 }
 0x16c   : > { %1602 = vmatmul.msk.bf16.vlgmr.msra.gmra.mxu2 %vm755_vm0, %v793_v35 }
 0x1e8   : > { %v826_v37 = vpop.f32.mrf.mxu0  ;;  %v859_v38 = vpop.f32.mrf.mxu1 }
 0x1e9   : > { %v860_v39 = vadd.f32 %v1776_v36, %v859_v38  ;;  %v827_v44 = vadd.f32 %v1775_v40, %v826_v37 }
 0x1eb   : > { %v909_v41 = vpack.c.bf16 %v860_v39, %v860_v39  ;;  %v908_v50 = vpack.c.bf16 %v827_v44, %v827_v44 }
 0x1ed   : > { %1071 = vrot.lane.b32.xlu0 %v909_v41, %s2106_s0  ;;  %971 = vrot.lane.b32.xlu2 %v909_v41, %s2107_s17  ;;  %v915_v43 = vsel %vm910_vm5, %v909_v41, 0 }
 0x1ee   : > { %924 = vmatpush.bf16.xpose.msra.mxu3 %v915_v43 }
 0x1ef   : > { %v892_v45 = vpop.f32.mrf.mxu2 }
 0x1f0   : > { %v893_v46 = vadd.f32 %v1777_v42, %v892_v45  ;;  %v828_v47 = vpop.f32.mrf.mxu0  ;;  %v861_v48 = vpop.f32.mrf.mxu1 }
 0x1f2   : > { %v2406_v49 = vpack.c.bf16 %v893_v46, %v893_v46 }
 0x1f4   : > { %v950_v51 = vsel %vm948_vm6, %v2406_v49, 0 }
 0x1f5   : > { %959 = vmatpush.bf16.msrb.mxu0 %v950_v51  ;;  %968 = vrot.lane.b32.xlu2 %v908_v50, %s2107_s17 }
 0x1f6   : > { %1603 = vmatmul.msk.bf16.vlgmr.msra.gmra.mxu3 %vm910_vm5, %v908_v50 }
 0x1f7   : > { %v894_v52 = vpop.f32.mrf.mxu2  ;;  %1044 = vmatpush.bf16.msrb.mxu3 %v1035_v63 }
 0x1f9   : > { %1063 = vmatpush.bf16.msra.mxu0 %v1054_v28  ;;  %v1210_v28 = vld [vmem:[#allocation11 + $0xc] sm:$0xf] }
 0x1fd   : > { %1152 = vrot.lane.b32.xlu2 %v909_v41, %s2108_s7 }
 0x205   : > { %1150 = vrot.lane.b32.xlu2 %v908_v50, %s2108_s7 }
 0x247   : > { %v972_v53 = vpop.permute.xlu2 %971 }
 0x248   : > { %v977_v54 = vsel %vm910_vm5, %v972_v53, 0 }
 0x249   : > { %986 = vmatpush.bf16.xpose.msrb.mxu1 %v977_v54 }
 0x24f   : > { %v969_v55 = vpop.permute.xlu2 %968 }
 0x250   : > { %1605 = vmatmul.msk.bf16.vlgmr.msrb.gmra.mxu1 %vm910_vm5, %v969_v55 }
 0x257   : > { %v1153_v20 = vpop.permute.xlu2 %1152 }
 0x258   : > { %v1158_v33 = vsel %vm910_vm5, %v1153_v20, 0 }
 0x25f   : > { %v1072_v56 = vpop.permute.xlu0 %1071  ;;  %v1151_v21 = vpop.permute.xlu2 %1150 }
 0x260   : > { %v1077_v57 = vsel %vm910_vm5, %v1072_v56, 0 }
 0x261   : > { %1086 = vmatpush.bf16.xpose.msra.mxu1 %v1077_v57 }
 0x279   : > { %v926_v2 = vpop.f32.mrf.mxu3 }
 0x27a   : > { %v930_v5 = vmul.f32 0.35355338, %v926_v2 }
 0x27c   : > { %v931_v6 = vadd.f32 %v930_v5, %v2419_v4 }
 0x27e   : > { %v932_v7 = vsel %vm910_vm5, %v931_v6, -inf }
 0x27f   : > { %933 = vmax.xlane.f32.xlu1 %v932_v7 }
 0x281   : > { %v928_v9 = vpop.f32.mrf.mxu3 }
 0x2cd   : > { %v988_v10 = vpop.f32.mrf.mxu1 }
 0x2ce   : > { %v992_v11 = vmul.f32 0.35355338, %v988_v10 }
 0x2d0   : > { %v993_v12 = vadd.f32 %v992_v11, %v2419_v4 }
 0x2d2   : > { %v994_v13 = vsel %vm910_vm5, %v993_v12, -inf }
 0x2d3   : > { %995 = vmax.xlane.f32.xlu2 %v994_v13 }
 0x2d5   : > { %v990_v14 = vpop.f32.mrf.mxu1 }
 0x2f2   : > { %v934_v15 = vpop.xlane.xlu1 %933 }
 0x2f3   : > { %v935_v16 = vsub.f32 %v931_v6, %v934_v15 }
 0x2f5   : > { %v936_v17 = vmul.f32 1.442695, %v935_v16  ;;  %v1129_v16 = vld [vmem:[#allocation11 + $0x8] sm:$0xf] }
 0x2f7   : > { %1787 = vpow2.f32 %v936_v17 }
 0x2fd   : > { %v1788_v18 = vpop.eup %1787 }
 0x2fe   : > { %v938_v19 = vsel %vm910_vm5, %v1788_v18, 0.0 }
 0x2ff   : > { %939 = vadd.xlane.f32.xlu1 %v938_v19 }
 0x318   : > { %1069 = vrot.lane.b32.xlu1 %v908_v50, %s2106_s0 }
 0x346   : > { %v996_v22 = vpop.xlane.xlu2 %995 }
 0x347   : > { %v997_v23 = vsub.f32 %v993_v12, %v996_v22 }
 0x349   : > { %v998_v24 = vmul.f32 1.442695, %v997_v23 }
 0x34b   : > { %1789 = vpow2.f32 %v998_v24 }
 0x351   : > { %v1790_v25 = vpop.eup %1789 }
 0x352   : > { %v1000_v26 = vsel %vm910_vm5, %v1790_v25, 0.0 }
 0x353   : > { %1001 = vadd.xlane.f32.xlu2 %v1000_v26 }
 0x372   : > { %v940_v29 = vpop.xlane.xlu1 %939 }
 0x373   : > { %1791 = vrcp.f32 %v940_v29  ;;  %v1215_v29 = vsel %vm948_vm6, %v1210_v28, 0 }
 0x379   : > { %v1792_v30 = vpop.eup %1791 }
 0x37a   : > { %v942_v31 = vmul.f32 %v1792_v30, %v1788_v18  ;;  %v1134_v18 = vsel %vm948_vm6, %v1129_v16, 0 }
 0x37b   : > { %1143 = vmatpush.bf16.msra.mxu3 %v1134_v18 }
 0x37c   : > { %v943_v32 = vpack.c.bf16 %v942_v31, %v942_v31 }
 0x37e   : > { %1604 = vmatmul.msk.bf16.vlgmr.msrb.gmra.mxu0 %vm910_vm5, %v943_v32 }
 0x37f   : > { %1167 = vmatpush.bf16.xpose.msrb.mxu0 %v1158_v33 }
 0x38a   : > { %v1070_v34 = vpop.permute.xlu1 %1069 }
 0x38b   : > { %1609 = vmatmul.msk.bf16.vlgmr.msra.gmra.mxu1 %vm910_vm5, %v1070_v34 }
 0x3c6   : > { %v1002_v48 = vpop.xlane.xlu2 %1001 }
 0x3fb   : > { %v961_v35 = vpop.f32.mrf.mxu0 }
 0x3fc   : > { %v965_v36 = vpack.c.bf16 %v961_v35, %v961_v35 }
 0x3fe   : > { %1608 = vmatmul.msk.bf16.vlgmr.msra.gmra.mxu0 %vm910_vm5, %v965_v36 }
 0x403   : > { %v963_v37 = vpop.f32.mrf.mxu0 }
 0x408   : > { %v1088_v38 = vpop.f32.mrf.mxu1 }
 0x409   : > { %v1092_v39 = vmul.f32 0.35355338, %v1088_v38 }
 0x40b   : > { %v1093_v40 = vadd.f32 %v1092_v39, %v2419_v4  ;;  %v1778_v39 = vld [vmem:[%s2547_s13] ss:$0 sm:$0xff] }
 0x40d   : > { %v1094_v41 = vsel %vm910_vm5, %v1093_v40, -inf }
 0x40e   : > { %1612 = vmatmul.msk.bf16.vlgmr.msrb.gmra.mxu0 %vm910_vm5, %v1151_v21  ;;  %1095 = vmax.xlane.f32.xlu0 %v1094_v41 }
 0x410   : > { %v1090_v42 = vpop.f32.mrf.mxu1 }
 0x422   : > { %1007 = vrot.lane.b32.xlu0 %v2406_v49, %s2107_s17 }
 0x47b   : > { %v2438_v43 = vpop.f32.mrf.mxu0 }
 0x481   : > { %v1096_v44 = vpop.xlane.xlu0 %1095 }
 0x482   : > { %v1097_v45 = vsub.f32 %v1093_v40, %v1096_v44 }
 0x483   : > { %v1067_v46 = vpop.f32.mrf.mxu0 }
 0x484   : > { %v1098_v47 = vmul.f32 1.442695, %v1097_v45 }
 0x486   : > { %1793 = vpow2.f32 %v1098_v47 }
 0x487   : > { %1795 = vrcp.f32 %v1002_v48 }
 0x48b   : > { %v1169_v50 = vpop.f32.mrf.mxu0 }
 0x48c   : > { %v1794_v51 = vpop.eup %1793  ;;  %v1173_v52 = vmul.f32 0.35355338, %v1169_v50  ;;  %v1653_v50 = vld [vmem:[#allocation13 + $0x8] sm:$0xff] }
 0x48d   : > { %v1100_v53 = vsel %vm910_vm5, %v1794_v51, 0.0  ;;  %v1796_v55 = vpop.eup %1795 }
 0x48e   : > { %1101 = vadd.xlane.f32.xlu2 %v1100_v53  ;;  %v1174_v54 = vadd.f32 %v1173_v52, %v2419_v4  ;;  %v1004_v57 = vmul.f32 %v1796_v55, %v1790_v25 }
 0x490   : > { %v1175_v56 = vsel %vm910_vm5, %v1174_v54, -inf  ;;  %v1005_v61 = vpack.c.bf16 %v1004_v57, %v1004_v57 }
 0x491   : > { %1176 = vmax.xlane.f32.xlu1 %v1175_v56 }
 0x493   : > { %v1171_v58 = vpop.f32.mrf.mxu0 }
 0x494   : > { %v1008_v59 = vpop.permute.xlu0 %1007 }
 0x495   : > { %v1013_v60 = vsel %vm948_vm6, %v1008_v59, 0 }
 0x496   : > { %1022 = vmatpush.bf16.msrb.mxu2 %v1013_v60  ;;  %v1779_v60 = vld [vmem:[%s2548_s14] ss:$0 sm:$0xff] }
 0x499   : > { %1606 = vmatmul.msk.bf16.vlgmr.msrb.gmra.mxu2 %vm910_vm5, %v1005_v61 }
 0x4aa   : > { %1106 = vrot.lane.b32.xlu1 %v2406_v49, %s2106_s0  ;;  %s2589_s0 = sld [smem:[#allocation32_spill]] }
 0x4b0   : > { %s1418_s17 = scalar_lea.hbm %s2589_s0, %s1643_s3 }
 0x4b1   : > { %s1422_s28 = sshll.u32 %s1418_s17, 4  ;;  %s1423_s28 = int_to_ptr.hbm [resolvable:$true] %s1422_s28 }
 0x4b2   : > { %s2031_s6 = sshra.s32 %s1423_s28, 4  ;;  %s2032_s6 = int_to_ptr.hbm [resolvable:$true] %s2031_s6 }
 0x4b3   : > { %s2033_s3 = scalar_lea.hbm %s2032_s6, 8  ;;  %p2038_p7 = scmp.lt.s32.totalorder %s2032_s6, %s2589_s0 }
 0x4b4   : > { %p2034_p1 = scmp.ne.s32.totalorder %s2032_s6, %s2033_s3 }
 0x4b6   : > { %p2035_p4 = pnand %p2034_p1, %p2313_p5 }
 0x4b8   : > { %p2036_p12 = pneg %p2035_p4 }
 0x501   : > { %v1102_v5 = vpop.xlane.xlu2 %1101 }
 0x504   : > { %v1177_v1 = vpop.xlane.xlu1 %1176 }
 0x505   : > { %v1178_v2 = vsub.f32 %v1174_v54, %v1177_v1 }
 0x507   : > { %v1179_v3 = vmul.f32 1.442695, %v1178_v2 }
 0x509   : > { %1797 = vpow2.f32 %v1179_v3  ;;  %v1781_v3 = vld [vmem:[%s2587_s19] ss:$0 sm:$0xff] }
 0x50a   : > { %1799 = vrcp.f32 %v1102_v5 }
 0x50f   : > { %v1798_v4 = vpop.eup %1797 }
 0x510   : > { %v1181_v6 = vsel %vm910_vm5, %v1798_v4, 0.0  ;;  %v1800_v7 = vpop.eup %1799 }
 0x511   : > { %1182 = vadd.xlane.f32.xlu2 %v1181_v6  ;;  %v1104_v9 = vmul.f32 %v1800_v7, %v1794_v51  ;;  %v1652_v51 = vld [vmem:[#allocation13] sm:$0xff] }
 0x513   : > { %v1105_v14 = vpack.c.bf16 %v1104_v9, %v1104_v9 }
 0x51c   : > { %v1024_v10 = vpop.f32.mrf.mxu2  ;;  %v1107_v11 = vpop.permute.xlu1 %1106 }
 0x51d   : > { %v1028_v12 = vpack.c.bf16 %v1024_v10, %v1024_v10  ;;  %v1112_v13 = vsel %vm948_vm6, %v1107_v11, 0 }
 0x51e   : > { %1121 = vmatpush.bf16.msra.mxu2 %v1112_v13 }
 0x51f   : > { %1607 = vmatmul.msk.bf16.vlgmr.msrb.gmra.mxu3 %vm910_vm5, %v1028_v12 }
 0x520   : > { %1299 = vmatpush.bf16.msrb.mxu3 %v1653_v50 }
 0x521   : > { %1610 = vmatmul.msk.bf16.vlgmr.msra.gmra.mxu2 %vm910_vm5, %v1105_v14 }
 0x522   : > { %1224 = vmatpush.bf16.msrb.mxu2 %v1215_v29 }
 0x524   : > { %v1026_v15 = vpop.f32.mrf.mxu2  ;;  %1300 = vmatpush.bf16.msrb.mxu3 %v1652_v51 }
 0x529   : > { %1187 = vrot.lane.b32.xlu2 %v2406_v49, %s2108_s7  ;;  %s2588_s7 = sld [smem:[#allocation30_spill]] }
 0x52f   : > { %v1657_v11 = vld [vmem:[%s2588_s7 + $0x18] sm:$0xff]  ;;  %v1656_v16 = vld [vmem:[%s2588_s7 + $0x10] sm:$0xff] }
 0x530   : > { %1391 = vmatpush.bf16.msra.mxu0 %v1657_v11 }
 0x534   : > { %1392 = vmatpush.bf16.msra.mxu0 %v1656_v16 }
 0x584   : > { %v1183_v17 = vpop.xlane.xlu2 %1182 }
 0x585   : > { %1801 = vrcp.f32 %v1183_v17 }
 0x58b   : > { %v1802_v19 = vpop.eup %1801 }
 0x58c   : > { %v1185_v20 = vmul.f32 %v1802_v19, %v1798_v4  ;;  %v1188_v21 = vpop.permute.xlu2 %1187 }
 0x58d   : > { %v1193_v22 = vsel %vm948_vm6, %v1188_v21, 0  ;;  %v1655_v21 = vld [vmem:[%s2588_s7 + $0x8] sm:$0xff] }
 0x58e   : > { %v1186_v23 = vpack.c.bf16 %v1185_v20, %v1185_v20  ;;  %1202 = vmatpush.bf16.msrb.mxu1 %v1193_v22  ;;  %1393 = vmatpush.bf16.msra.mxu0 %v1655_v21 }
 0x591   : > { %1613 = vmatmul.msk.bf16.vlgmr.msrb.gmra.mxu1 %vm910_vm5, %v1186_v23 }
 0x5a2   : > { %v1046_v24 = vpop.f32.mrf.mxu3 }
 0x5a3   : > { %v1066_v33 = vadd.f32 %v2438_v43, %v1046_v24 }
 0x5a4   : > { %v1123_v25 = vpop.f32.mrf.mxu2 }
 0x5a5   : > { %v1127_v26 = vpack.c.bf16 %v1123_v25, %v1123_v25  ;;  %v1654_v25 = vld [vmem:[%s2588_s7] sm:$0xff] }
 0x5a6   : > { %1394 = vmatpush.bf16.msra.mxu0 %v1654_v25 }
 0x5a7   : > { %1611 = vmatmul.msk.bf16.vlgmr.msra.gmra.mxu3 %vm910_vm5, %v1127_v26 }
 0x5aa   : > { %v1048_v49 = vpop.f32.mrf.mxu3 }
 0x5ac   : > { %v1125_v27 = vpop.f32.mrf.mxu2 }
 0x60e   : > { %v1204_v30 = vpop.f32.mrf.mxu1 }
 0x60f   : > { %v1208_v31 = vpack.c.bf16 %v1204_v30, %v1204_v30 }
 0x611   : > { %1614 = vmatmul.msk.bf16.vlgmr.msrb.gmra.mxu2 %vm910_vm5, %v1208_v31 }
 0x616   : > { %v1206_v32 = vpop.f32.mrf.mxu1 }
 0x62a   : > { %v1145_v34 = vpop.f32.mrf.mxu3 }
 0x62b   : > { %v1149_v35 = vadd.f32 %v1145_v34, %v1066_v33 }
 0x632   : > { %v1147_v36 = vpop.f32.mrf.mxu3 }
 0x694   : > { %v1226_v37 = vpop.f32.mrf.mxu2 }
 0x695   : > { %v1230_v38 = vadd.f32 %v1226_v37, %v1149_v35 }
 0x697   : > { %v1231_v40 = vadd.f32 %v1230_v38, %v2369_v0 }
 0x699   : > { %v2465_v41 = vadd.f32 %v1778_v39, %v1231_v40 }
 0x69b   : > { %v1239_v42 = vsel %vm755_vm0, %v2465_v41, 0.0 }
 0x69c   : > { %v1228_v44 = vpop.f32.mrf.mxu2  ;;  %1240 = vadd.xlane.f32.xlu0 %v1239_v42 }
 0x70f   : > { %v1241_v45 = vpop.xlane.xlu0 %1240 }
 0x710   : > { %v1242_v43 = vmul.f32 %v1241_v45, %v2373_v8 }
 0x712   : > { %v1243_v46 = vsub.f32 %v2465_v41, %v1242_v43 }
 0x714   : > { %v1244_v47 = vmul.f32 %v1243_v46, %v1243_v46 }
 0x716   : > { %v1245_v48 = vsel %vm755_vm0, %v1244_v47, 0.0 }
 0x717   : > { %1246 = vadd.xlane.f32.xlu1 %v1245_v48 }
 0x78a   : > { %v1247_v0 = vpop.xlane.xlu1 %1246 }
 0x78b   : > { %v1248_v52 = vmul.f32 %v1247_v0, %v2373_v8  ;;  %v1780_v8 = vld [vmem:[%s2586_s15] ss:$0 sm:$0xff]  ;;  %s1574_s15 = sshll.u32 %s2344_s2, 3 }
 0x78c   : > { %s746_s9 = scalar_lea.vmem [#allocation14], %s1574_s15  ;;  %s2037_s15 = scalar_lea.hbm %s2589_s0, 16 }
 0x78d   : > { %v1249_v53 = vadd.f32 1e-05, %v1248_v52  ;;  %v1782_v52 = vld [vmem:[%s2590_s5] ss:$0 sm:$0xff]  ;;  %s1420_s12 = sshll.u32 %s746_s9, 4  ;;  %p2039_p8 = scmp.lt.s32.totalorder %s2037_s15, %s2033_s3  ;;  %s1421_s12 = int_to_ptr.vmem [resolvable:$true] %s1420_s12 }
 0x78f   : > { %1803 = vrsqrt.f32 %v1249_v53  ;;  %vm1256_vm12 = vweird.f32 %v1249_v53  ;;  %p2040_p9 = por %p2039_p8, %p2038_p7 }
 0x791   : > { %p2041_p10 = pnand %p2040_p9, %p2036_p12 }
 0x795   : > { %v1804_v54 = vpop.eup %1803 }
 0x796   : > { %v1251_v55 = vmul.f32 %v1804_v54, %v1249_v53  ;;  %vm1257_vm11 = vweird.f32 %v1804_v54 }
 0x797   : > { %vm1258_vm13 = vmor %vm1256_vm12, %vm1257_vm11 }
 0x798   : > { %v1252_v56 = vmul.f32 %v1804_v54, %v1251_v55 }
 0x79a   : > { %v1253_v57 = vmul.f32 0.5, %v1252_v56 }
 0x79c   : > { %v1254_v58 = vsub.f32 1.5, %v1253_v57 }
 0x79e   : > { %v1255_v59 = vmul.f32 %v1804_v54, %v1254_v58 }
 0x7a0   : > { %v1259_v61 = vsel %vm1258_vm13, %v1804_v54, %v1255_v59 }
 0x7a1   : > { %v1260_v62 = vmul.f32 %v1259_v61, %v1243_v46 }
 0x7a3   : > { %v1264_v63 = vmul.f32 %v1779_v60, %v1260_v62 }
 0x7a5   : > { %v1268_v1 = vadd.f32 %v1780_v8, %v1264_v63 }
 0x7a7   : > { %v1269_v2 = vpack.c.bf16 %v1268_v1, %v1268_v1 }
 0x7a9   : > { %1623 = vmatmul.msk.bf16.vlgmr.msrb.gmra.mxu3 %vm755_vm0, %v1269_v2 }
 0x82c   : > { %v1302_v4 = vpop.f32.mrf.mxu3 }
 0x82d   : > { %v1303_v5 = vadd.f32 %v1781_v3, %v1302_v4 }
 0x82f   : > { %v1307_v6 = vmul.f32 0.70710677, %v1303_v5  ;;  %v1306_v48 = vmul.f32 0.5, %v1303_v5 }
 0x831   : > { %v1308_v7 = vmul.f32 %v1307_v6, %v1307_v6 }
 0x833   : > { %v1309_v9 = vmin.f32 %v1308_v7, 16.0 }
 0x834   : > { %v1304_v10 = vpop.f32.mrf.mxu3 }
 0x835   : > { %v1310_v12 = vmul.f32 2.1237322e-06, %v1309_v9  ;;  %v1321_v13 = vmul.f32 3.8918573e-05, %v1309_v9 }
 0x837   : > { %v1311_v14 = vadd.f32 0.00028619796, %v1310_v12  ;;  %v1322_v15 = vadd.f32 0.001143296, %v1321_v13 }
 0x839   : > { %v1312_v17 = vmul.f32 %v1311_v14, %v1309_v9  ;;  %v1323_v18 = vmul.f32 %v1322_v15, %v1309_v9 }
 0x83b   : > { %v1324_v19 = vadd.f32 0.014752088, %v1323_v18  ;;  %v1313_v20 = vadd.f32 0.0036580483, %v1312_v17 }
 0x83d   : > { %v1325_v22 = vmul.f32 %v1324_v19, %v1309_v9  ;;  %v1314_v24 = vmul.f32 %v1313_v20, %v1309_v9 }
 0x83f   : > { %v1326_v23 = vadd.f32 0.112945676, %v1325_v22  ;;  %v1315_v27 = vadd.f32 0.05243302, %v1314_v24 }
 0x841   : > { %v1327_v26 = vmul.f32 %v1326_v23, %v1309_v9  ;;  %v1316_v30 = vmul.f32 %v1315_v27, %v1309_v9 }
 0x843   : > { %v1328_v49 = vadd.f32 0.4994258, %v1327_v26  ;;  %v1317_v31 = vadd.f32 0.18741608, %v1316_v30 }
 0x845   : > { %v1329_v28 = vmul.f32 %v1328_v49, %v1309_v9  ;;  %v1318_v33 = vmul.f32 %v1317_v31, %v1309_v9 }
 0x847   : > { %v1330_v29 = vadd.f32 1.0, %v1329_v28  ;;  %v1319_v37 = vadd.f32 1.1283791, %v1318_v33 }
 0x849   : > { %1805 = vrcp.f32 %v1330_v29  ;;  %v1342_v36 = vand.u32 2147483648, %v1330_v29  ;;  %v1340_v39 = vand.u32 2147483647, %v1330_v29  ;;  %vm1336_vm15 = vweird.f32 %v1330_v29 }
 0x84a   : > { %v1320_v44 = vmul.f32 %v1319_v37, %v1307_v6 }
 0x84b   : > { %v1343_v42 = vor.u32 1.1754944e-38, %v1342_v36  ;;  %vm1341_vm2 = vcmp.eq.f32.partialorder %v1340_v39, 8.507059e+37 }
 0x84f   : > { %v1806_v32 = vpop.eup %1805 }
 0x850   : > { %v1332_v34 = vmul.f32 %v1806_v32, %v1330_v29  ;;  %vm1337_vm14 = vweird.f32 %v1806_v32 }
 0x851   : > { %vm1338_vm1 = vmor %vm1336_vm15, %vm1337_vm14 }
 0x852   : > { %v1333_v35 = vsub.f32 1.0, %v1332_v34 }
 0x854   : > { %v1334_v38 = vmul.f32 %v1806_v32, %v1333_v35 }
 0x856   : > { %v1335_v40 = vadd.f32 %v1806_v32, %v1334_v38 }
 0x858   : > { %v1339_v45 = vsel %vm1338_vm1, %v1806_v32, %v1335_v40 }
 0x859   : > { %v1344_v43 = vsel %vm1341_vm2, %v1343_v42, %v1339_v45 }
 0x85a   : > { %v1345_v46 = vmul.f32 %v1344_v43, %v1320_v44 }
 0x85c   : > { %v1624_v47 = vclamps-f32 %v1345_v46, 1.0 }
 0x85e   : > { %v1348_v50 = vadd.f32 1.0, %v1624_v47 }
 0x860   : > { %v1349_v51 = vmul.f32 %v1348_v50, %v1306_v48 }
 0x862   : > { %v1350_v0 = vpack.c.bf16 %v1349_v51, %v1349_v51 }
 0x864   : > { %1641 = vmatmul.msk.bf16.vlgmr.msra.gmra.mxu0 %vm1383_vm3, %v1350_v0 }
 0x8e1   : > { %v1396_v53 = vpop.f32.mrf.mxu0 }
 0x8e2   : > { %v1400_v54 = vadd.f32 %v1396_v53, %v2465_v41 }
 0x8e4   : > { %v1405_v55 = vadd.f32 %v1782_v52, %v1400_v54 }
 0x8e6   : > { %1406 = vst.msk [vmem:[%s746_s9] sm:$0xff] %vm755_vm0, %v1405_v55 }
 0x8e7   : > { %2044 = shalt.err (!%p2041_p10)
}
 0x8e8   : > { %1684 = dma.vmem_to_hbm [thread:$0]  (%p2313_p5), %s1421_s12, 128, %s1423_s28, %s1408_s27  }
 0x8e9   : > { %v1398_v41 = vpop.f32.mrf.mxu0 }
 0x8ea PF: > { %s1434_s2 = sand.u32 1, %s2083_s1   ;;  %p2591_p13 = scmp.ge.s32.totalorder %s2095_s24, 2 }
 0x8eb   : > { %s1435_s20 = scalar_lea.sflag [#allocation4], %s1434_s2 }
 0x8ec   : > { %p1710_p11 = pnand %p2591_p13, %p2317_p6 }
 0x8ee   : > { %p1711_p0 = pneg %p1710_p11 }
 0x8f0   : > { %2078 = dma.done.wait (%p1711_p0), %s1435_s20, 128  }
 0x8f1   : > { %2080 = vsyncadd (%p1711_p0), %s1435_s20, 4294967168  ;;  %p36_p2 = scmp.ge.s32.totalorder %s2287_s4, 4   ;;  %s2592_s1 = smov %s2087_s22 }
 0x8f2   : > { %s2593_s22 = smov %s2091_s23  ;;  %s2594_s23 = smov %s2298_s21 }
 0x8f3   : > { %s2595_s24 = smov %s2287_s4  ;;  %38 = sbr.rel (!%p36_p2) target bundleno = 22 (0x16), region = 175 }
 0x8f8   :  { %1441 = vsyncpa [#allocation3], 1 }
 0x8f9   :  { %1443 = vsyncpa [#allocation3 + $0x1], 1 }
 0x8fa   :  { %1444 = vsyncpa [#allocation6], 1 }
 0x8fb   :  { %1445 = vsyncpa [#allocation9], 1 }
 0x8fc   :  { %1446 = vsyncpa [#allocation12], 1 }
 0x8fd   :  { %1447 = vsyncpa [#allocation4], 1 }
 0x8fe   :  { %1449 = vsyncpa [#allocation4 + $0x1], 1 }

</bundles_post_ra>
